<compile_context>
chip_gen: v5e
topology: v5e:2x2
jax: 0.10.0
libtpu: 0.0.40
codegen_flags: <defaults>
</compile_context>

<pallas_src>
import jax
import jax.numpy as jnp
from jax import lax
from jax.experimental import pallas as pl
from jax.experimental.pallas import tpu as pltpu


def convs_kernel(x_ref, w1t_ref, wdw_ref, bdw_ref, wf_ref, bf_ref,
                 o_ref, y1p_ref):
    # x_ref:   (1, H, W, Cin)   un-padded NHWC input tile (one batch element)
    # w1t_ref: (Cin, Cin)       conv weight, pre-transposed (y = x @ w1t)
    # wdw_ref: (9, Cin)         depthwise 3x3 weights, tap-major (t = dy*3+dx)
    # bdw_ref: (1, Cin)         depthwise bias (f32)
    # wf_ref:  (Cin, Cout)      fused point_conv∘conv3 weight (pre-transposed)
    # bf_ref:  (1, Cout)        fused bias  (bpw @ w3t), f32
    # o_ref:   (1, H, W, Cout)
    # y1p_ref: (H+2, W+2, Cin)  f32 VMEM scratch; zero border = conv padding
    _, H, W, Cin = x_ref.shape
    Cout = o_ref.shape[3]
    cdt = w1t_ref.dtype  # compute dtype for the MXU matmuls (bf16 or f32)

    # Maintain the 1-pixel zero border of the scratch.  Re-written every grid
    # step so the kernel stays correct even when the batch axis is sharded
    # across TensorCores (scratch memory is not zero-initialized).
    zrow = jnp.zeros((1, W + 2, Cin), jnp.float32)
    zcol = jnp.zeros((H, 1, Cin), jnp.float32)
    y1p_ref[0:1, :, :] = zrow
    y1p_ref[H + 1:H + 2, :, :] = zrow
    y1p_ref[1:H + 1, 0:1, :] = zcol
    y1p_ref[1:H + 1, W + 1:W + 2, :] = zcol

    # --- conv (1x1, no bias): interior rows only, bf16 MXU / f32 accumulate ---
    x = x_ref[0].reshape(H * W, Cin).astype(cdt)
    y1 = jnp.dot(x, w1t_ref[...], preferred_element_type=jnp.float32)
    y1p_ref[1:H + 1, 1:W + 1, :] = y1.reshape(H, W, Cin)

    # --- depthwise 3x3, padding=1 (zero border lives in the scratch) ---
    # Tap 0 + bias initialize the accumulator (no zero pass, no extra bias
    # pass over the (H, W, Cin) tile).  Static unrolled taps -> pure VPU.
    acc = y1p_ref[0:H, 0:W, :] * wdw_ref[0] + bdw_ref[0]
    for t in range(1, 9):
        dy, dx = divmod(t, 3)
        acc = acc + y1p_ref[dy:dy + H, dx:dx + W, :] * wdw_ref[t]

    # --- fused point_conv + conv3: single 1x1 matmul + fused bias ---
    y2 = acc.reshape(H * W, Cin).astype(cdt)
    yo = jnp.dot(y2, wf_ref[...], preferred_element_type=jnp.float32) + bf_ref[0]
    o_ref[0] = yo.reshape(H, W, Cout).astype(o_ref.dtype)


def convs_pallas(x_nchw, params, compute_dtype=jnp.bfloat16):
    """x_nchw: (N, Cin, H, W) float32. Returns (N, Cout, H, W) float32."""
    W1, Wdw, bdw, Wp, bpw, W3 = params
    N, Cin, H, W = x_nchw.shape
    Cout = W3.shape[0]  # conv3 output channels (== in_ch == out_ch)

    # NCHW -> NHWC (single transpose; no wrapper-side padding / extra HBM pass).
    x_nhwc = jnp.transpose(x_nchw, (0, 2, 3, 1))

    # Pre-arrange weights (kernel computes x @ Wt).
    w1t = jnp.transpose(W1[:, :, 0, 0]).astype(compute_dtype)   # (Cin, Cin)
    wdw9 = jnp.transpose(Wdw[:, 0].reshape(Cin, 9))             # (9, Cin) f32
    bdw2 = bdw.reshape(1, Cin)                                  # (1, Cin) f32
    # Fuse point_conv (with bias) and conv3 (no bias): both are 1x1 linears.
    wpt = jnp.transpose(Wp[:, :, 0, 0])                         # (Cin, Cmid)
    w3t = jnp.transpose(W3[:, :, 0, 0])                         # (Cmid, Cout)
    wf = (wpt @ w3t).astype(compute_dtype)                      # (Cin, Cout)
    bf = (bpw @ w3t).reshape(1, Cout)                           # (1, Cout) f32

    out_nhwc = pl.pallas_call(
        convs_kernel,
        out_shape=jax.ShapeDtypeStruct((N, H, W, Cout), jnp.float32),
        grid=(N,),
        in_specs=[
            pl.BlockSpec((1, H, W, Cin), lambda b: (b, 0, 0, 0)),
            pl.BlockSpec((Cin, Cin), lambda b: (0, 0)),
            pl.BlockSpec((9, Cin), lambda b: (0, 0)),
            pl.BlockSpec((1, Cin), lambda b: (0, 0)),
            pl.BlockSpec((Cin, Cout), lambda b: (0, 0)),
            pl.BlockSpec((1, Cout), lambda b: (0, 0)),
        ],
        out_specs=pl.BlockSpec((1, H, W, Cout), lambda b: (b, 0, 0, 0)),
        scratch_shapes=[pltpu.VMEM((H + 2, W + 2, Cin), jnp.float32)],
        compiler_params=pltpu.CompilerParams(
            dimension_semantics=("parallel",),
            vmem_limit_bytes=32 * 1024 * 1024),
    )(x_nhwc, w1t, wdw9, bdw2, wf, bf)

    # TODO(synk): add halo H-tiling (pl.Element / manual DMA) for large images
    # so VMEM stays bounded and v7x's two TensorCores get >N grid steps.
    return jnp.transpose(out_nhwc, (0, 3, 1, 2))


def convs_reference(x_nchw, params):
    """Pure-JAX NCHW reference mirroring the PyTorch module."""
    W1, Wdw, bdw, Wp, bpw, W3 = params
    dn = ("NCHW", "OIHW", "NCHW")
    Cin = W1.shape[0]
    y = lax.conv_general_dilated(x_nchw, W1, (1, 1), "VALID",
                                 dimension_numbers=dn)
    y = lax.conv_general_dilated(y, Wdw, (1, 1), ((1, 1), (1, 1)),
                                 dimension_numbers=dn,
                                 feature_group_count=Cin)
    y = y + bdw[None, :, None, None]
    y = lax.conv_general_dilated(y, Wp, (1, 1), "VALID",
                                 dimension_numbers=dn)
    y = y + bpw[None, :, None, None]
    y = lax.conv_general_dilated(y, W3, (1, 1), "VALID",
                                 dimension_numbers=dn)
    return y


def make_params(key, in_ch, out_ch):
    ks = jax.random.split(key, 6)
    scale = 0.1
    W1 = scale * jax.random.normal(ks[0], (in_ch, in_ch, 1, 1), jnp.float32)
    Wdw = scale * jax.random.normal(ks[1], (in_ch, 1, 3, 3), jnp.float32)
    bdw = scale * jax.random.normal(ks[2], (in_ch,), jnp.float32)
    Wp = scale * jax.random.normal(ks[3], (out_ch, in_ch, 1, 1), jnp.float32)
    bpw = scale * jax.random.normal(ks[4], (out_ch,), jnp.float32)
    W3 = scale * jax.random.normal(ks[5], (in_ch, in_ch, 1, 1), jnp.float32)
    return (W1, Wdw, bdw, Wp, bpw, W3)


if __name__ == "__main__":
    key = jax.random.PRNGKey(0)
    kx, kp = jax.random.split(key)

    N, C, H, W = 2, 4, 16, 16
    in_ch = out_ch = C  # conv3(in_ch->in_ch) requires out_ch == in_ch

    x = jax.random.normal(kx, (N, C, H, W), jnp.float32)
    params = make_params(kp, in_ch, out_ch)

    ref = convs_reference(x, params)

    # Strict check with f32 compute dtype (exact algorithm equivalence).
    out_f32 = jax.block_until_ready(
        convs_pallas(x, params, compute_dtype=jnp.float32))
    assert out_f32.shape == ref.shape == (N, out_ch, H, W)
    assert jnp.allclose(out_f32, ref, atol=1e-4, rtol=1e-4), (
        float(jnp.max(jnp.abs(out_f32 - ref))))

    # Default bf16-MXU path (f32 accumulation); looser tolerance for bf16
    # operand rounding.
    out_bf16 = jax.block_until_ready(convs_pallas(x, params))
    assert out_bf16.shape == ref.shape
    assert jnp.allclose(out_bf16, ref, atol=3e-2, rtol=3e-2), (
        float(jnp.max(jnp.abs(out_bf16 - ref))))

    print("KERNEL_OK")
</pallas_src>

<mosaic_0001>
module attributes {stable_mosaic.version = 11 : i64} {
  func.func @convs_kernel(%arg0: i32, %arg1: memref<1x16x16x4xf32, #tpu.memory_space<vmem>>, %arg2: memref<4x4xf32, #tpu.memory_space<vmem>>, %arg3: memref<9x4xf32, #tpu.memory_space<vmem>>, %arg4: memref<1x4xf32, #tpu.memory_space<vmem>>, %arg5: memref<4x4xf32, #tpu.memory_space<vmem>>, %arg6: memref<1x4xf32, #tpu.memory_space<vmem>>, %arg7: memref<1x16x16x4xf32, #tpu.memory_space<vmem>>, %arg8: memref<18x18x4xf32, #tpu.memory_space<vmem>>) attributes {dimension_semantics = [#tpu.dimension_semantics<parallel>], iteration_bounds = array<i64: 2>, scalar_prefetch = 0 : i64, scratch_operands = 1 : i64, tpu.core_type = #tpu.core_type<tc>, window_params = [{transform_indices = @transform_0, window_bounds = array<i64: 1, 16, 16, 4>}, {pipeline_mode = #tpu.pipeline_mode<synchronous>, transform_indices = @transform_1, window_bounds = array<i64: 4, 4>}, {pipeline_mode = #tpu.pipeline_mode<synchronous>, transform_indices = @transform_2, window_bounds = array<i64: 9, 4>}, {pipeline_mode = #tpu.pipeline_mode<synchronous>, transform_indices = @transform_3, window_bounds = array<i64: 1, 4>}, {pipeline_mode = #tpu.pipeline_mode<synchronous>, transform_indices = @transform_4, window_bounds = array<i64: 4, 4>}, {pipeline_mode = #tpu.pipeline_mode<synchronous>, transform_indices = @transform_5, window_bounds = array<i64: 1, 4>}, {transform_indices = @transform_6, window_bounds = array<i64: 1, 16, 16, 4>}]} {
    %cst = arith.constant 0.000000e+00 : f32
    %0 = vector.broadcast %cst : f32 to vector<1x18x4xf32>
    %cst_0 = arith.constant 0.000000e+00 : f32
    %1 = vector.broadcast %cst_0 : f32 to vector<16x1x4xf32>
    %c0 = arith.constant 0 : index
    %c0_1 = arith.constant 0 : index
    %c0_2 = arith.constant 0 : index
    %2 = vector.load %arg8[%c0, %c0_1, %c0_2] : memref<18x18x4xf32, #tpu.memory_space<vmem>>, vector<1x18x4xf32>
    tpu.vector_store %arg8[%c0, %c0_1, %c0_2], %0 {strides = array<i32>} : memref<18x18x4xf32, #tpu.memory_space<vmem>>, vector<1x18x4xf32>,
    %c17 = arith.constant 17 : index
    %c0_3 = arith.constant 0 : index
    %c0_4 = arith.constant 0 : index
    %3 = vector.load %arg8[%c17, %c0_3, %c0_4] : memref<18x18x4xf32, #tpu.memory_space<vmem>>, vector<1x18x4xf32>
    tpu.vector_store %arg8[%c17, %c0_3, %c0_4], %0 {strides = array<i32>} : memref<18x18x4xf32, #tpu.memory_space<vmem>>, vector<1x18x4xf32>,
    %c1 = arith.constant 1 : index
    %c0_5 = arith.constant 0 : index
    %c0_6 = arith.constant 0 : index
    %4 = vector.load %arg8[%c1, %c0_5, %c0_6] : memref<18x18x4xf32, #tpu.memory_space<vmem>>, vector<16x1x4xf32>
    tpu.vector_store %arg8[%c1, %c0_5, %c0_6], %1 {strides = array<i32>} : memref<18x18x4xf32, #tpu.memory_space<vmem>>, vector<16x1x4xf32>,
    %c1_7 = arith.constant 1 : index
    %c17_8 = arith.constant 17 : index
    %c0_9 = arith.constant 0 : index
    %5 = vector.load %arg8[%c1_7, %c17_8, %c0_9] : memref<18x18x4xf32, #tpu.memory_space<vmem>>, vector<16x1x4xf32>
    tpu.vector_store %arg8[%c1_7, %c17_8, %c0_9], %1 {strides = array<i32>} : memref<18x18x4xf32, #tpu.memory_space<vmem>>, vector<16x1x4xf32>,
    %c0_10 = arith.constant 0 : index
    %c0_11 = arith.constant 0 : index
    %c0_12 = arith.constant 0 : index
    %c0_13 = arith.constant 0 : index
    %6 = vector.load %arg1[%c0_10, %c0_11, %c0_12, %c0_13] : memref<1x16x16x4xf32, #tpu.memory_space<vmem>>, vector<1x16x16x4xf32>
    %7 = vector.shape_cast %6 : vector<1x16x16x4xf32> to vector<16x16x4xf32>
    %8 = vector.shape_cast %7 : vector<16x16x4xf32> to vector<256x4xf32>
    %c0_14 = arith.constant 0 : index
    %c0_15 = arith.constant 0 : index
    %9 = vector.load %arg2[%c0_14, %c0_15] : memref<4x4xf32, #tpu.memory_space<vmem>>, vector<4x4xf32>
    %cst_16 = arith.constant dense<0.000000e+00> : vector<256x4xf32>
    %10 = tpu.matmul %8, %9, %cst_16 {dimension_numbers = #tpu.dot_dimension_numbers<[1], [0], [0], [1], [0, 0, 1, 1], [], []>} : vector<256x4xf32>, vector<4x4xf32>, vector<256x4xf32> -> vector<256x4xf32>
    %11 = vector.shape_cast %10 : vector<256x4xf32> to vector<16x16x4xf32>
    %c1_17 = arith.constant 1 : index
    %c1_18 = arith.constant 1 : index
    %c0_19 = arith.constant 0 : index
    %12 = vector.load %arg8[%c1_17, %c1_18, %c0_19] : memref<18x18x4xf32, #tpu.memory_space<vmem>>, vector<16x16x4xf32>
    tpu.vector_store %arg8[%c1_17, %c1_18, %c0_19], %11 {strides = array<i32>} : memref<18x18x4xf32, #tpu.memory_space<vmem>>, vector<16x16x4xf32>,
    %c0_20 = arith.constant 0 : index
    %c0_21 = arith.constant 0 : index
    %c0_22 = arith.constant 0 : index
    %13 = vector.load %arg8[%c0_20, %c0_21, %c0_22] : memref<18x18x4xf32, #tpu.memory_space<vmem>>, vector<16x16x4xf32>
    %c0_23 = arith.constant 0 : index
    %c0_24 = arith.constant 0 : index
    %14 = vector.load %arg3[%c0_23, %c0_24] : memref<9x4xf32, #tpu.memory_space<vmem>>, vector<1x4xf32>
    %15 = vector.shape_cast %14 : vector<1x4xf32> to vector<4xf32>
    %16 = vector.shape_cast %15 : vector<4xf32> to vector<1x1x4xf32>
    %17 = vector.broadcast %16 : vector<1x1x4xf32> to vector<16x16x4xf32>
    %18 = arith.mulf %13, %17 : vector<16x16x4xf32>
    %c0_25 = arith.constant 0 : index
    %c0_26 = arith.constant 0 : index
    %19 = vector.load %arg4[%c0_25, %c0_26] : memref<1x4xf32, #tpu.memory_space<vmem>>, vector<1x4xf32>
    %20 = vector.shape_cast %19 : vector<1x4xf32> to vector<4xf32>
    %21 = vector.shape_cast %20 : vector<4xf32> to vector<1x1x4xf32>
    %22 = vector.broadcast %21 : vector<1x1x4xf32> to vector<16x16x4xf32>
    %23 = arith.addf %18, %22 : vector<16x16x4xf32>
    %c0_27 = arith.constant 0 : index
    %c1_28 = arith.constant 1 : index
    %c0_29 = arith.constant 0 : index
    %24 = vector.load %arg8[%c0_27, %c1_28, %c0_29] : memref<18x18x4xf32, #tpu.memory_space<vmem>>, vector<16x16x4xf32>
    %c1_30 = arith.constant 1 : index
    %c0_31 = arith.constant 0 : index
    %25 = vector.load %arg3[%c1_30, %c0_31] : memref<9x4xf32, #tpu.memory_space<vmem>>, vector<1x4xf32>
    %26 = vector.shape_cast %25 : vector<1x4xf32> to vector<4xf32>
    %27 = vector.shape_cast %26 : vector<4xf32> to vector<1x1x4xf32>
    %28 = vector.broadcast %27 : vector<1x1x4xf32> to vector<16x16x4xf32>
    %29 = arith.mulf %24, %28 : vector<16x16x4xf32>
    %30 = arith.addf %23, %29 : vector<16x16x4xf32>
    %c0_32 = arith.constant 0 : index
    %c2 = arith.constant 2 : index
    %c0_33 = arith.constant 0 : index
    %31 = vector.load %arg8[%c0_32, %c2, %c0_33] : memref<18x18x4xf32, #tpu.memory_space<vmem>>, vector<16x16x4xf32>
    %c2_34 = arith.constant 2 : index
    %c0_35 = arith.constant 0 : index
    %32 = vector.load %arg3[%c2_34, %c0_35] : memref<9x4xf32, #tpu.memory_space<vmem>>, vector<1x4xf32>
    %33 = vector.shape_cast %32 : vector<1x4xf32> to vector<4xf32>
    %34 = vector.shape_cast %33 : vector<4xf32> to vector<1x1x4xf32>
    %35 = vector.broadcast %34 : vector<1x1x4xf32> to vector<16x16x4xf32>
    %36 = arith.mulf %31, %35 : vector<16x16x4xf32>
    %37 = arith.addf %30, %36 : vector<16x16x4xf32>
    %c1_36 = arith.constant 1 : index
    %c0_37 = arith.constant 0 : index
    %c0_38 = arith.constant 0 : index
    %38 = vector.load %arg8[%c1_36, %c0_37, %c0_38] : memref<18x18x4xf32, #tpu.memory_space<vmem>>, vector<16x16x4xf32>
    %c3 = arith.constant 3 : index
    %c0_39 = arith.constant 0 : index
    %39 = vector.load %arg3[%c3, %c0_39] : memref<9x4xf32, #tpu.memory_space<vmem>>, vector<1x4xf32>
    %40 = vector.shape_cast %39 : vector<1x4xf32> to vector<4xf32>
    %41 = vector.shape_cast %40 : vector<4xf32> to vector<1x1x4xf32>
    %42 = vector.broadcast %41 : vector<1x1x4xf32> to vector<16x16x4xf32>
    %43 = arith.mulf %38, %42 : vector<16x16x4xf32>
    %44 = arith.addf %37, %43 : vector<16x16x4xf32>
    %c1_40 = arith.constant 1 : index
    %c1_41 = arith.constant 1 : index
    %c0_42 = arith.constant 0 : index
    %45 = vector.load %arg8[%c1_40, %c1_41, %c0_42] : memref<18x18x4xf32, #tpu.memory_space<vmem>>, vector<16x16x4xf32>
    %c4 = arith.constant 4 : index
    %c0_43 = arith.constant 0 : index
    %46 = vector.load %arg3[%c4, %c0_43] : memref<9x4xf32, #tpu.memory_space<vmem>>, vector<1x4xf32>
    %47 = vector.shape_cast %46 : vector<1x4xf32> to vector<4xf32>
    %48 = vector.shape_cast %47 : vector<4xf32> to vector<1x1x4xf32>
    %49 = vector.broadcast %48 : vector<1x1x4xf32> to vector<16x16x4xf32>
    %50 = arith.mulf %45, %49 : vector<16x16x4xf32>
    %51 = arith.addf %44, %50 : vector<16x16x4xf32>
    %c1_44 = arith.constant 1 : index
    %c2_45 = arith.constant 2 : index
    %c0_46 = arith.constant 0 : index
    %52 = vector.load %arg8[%c1_44, %c2_45, %c0_46] : memref<18x18x4xf32, #tpu.memory_space<vmem>>, vector<16x16x4xf32>
    %c5 = arith.constant 5 : index
    %c0_47 = arith.constant 0 : index
    %53 = vector.load %arg3[%c5, %c0_47] : memref<9x4xf32, #tpu.memory_space<vmem>>, vector<1x4xf32>
    %54 = vector.shape_cast %53 : vector<1x4xf32> to vector<4xf32>
    %55 = vector.shape_cast %54 : vector<4xf32> to vector<1x1x4xf32>
    %56 = vector.broadcast %55 : vector<1x1x4xf32> to vector<16x16x4xf32>
    %57 = arith.mulf %52, %56 : vector<16x16x4xf32>
    %58 = arith.addf %51, %57 : vector<16x16x4xf32>
    %c2_48 = arith.constant 2 : index
    %c0_49 = arith.constant 0 : index
    %c0_50 = arith.constant 0 : index
    %59 = vector.load %arg8[%c2_48, %c0_49, %c0_50] : memref<18x18x4xf32, #tpu.memory_space<vmem>>, vector<16x16x4xf32>
    %c6 = arith.constant 6 : index
    %c0_51 = arith.constant 0 : index
    %60 = vector.load %arg3[%c6, %c0_51] : memref<9x4xf32, #tpu.memory_space<vmem>>, vector<1x4xf32>
    %61 = vector.shape_cast %60 : vector<1x4xf32> to vector<4xf32>
    %62 = vector.shape_cast %61 : vector<4xf32> to vector<1x1x4xf32>
    %63 = vector.broadcast %62 : vector<1x1x4xf32> to vector<16x16x4xf32>
    %64 = arith.mulf %59, %63 : vector<16x16x4xf32>
    %65 = arith.addf %58, %64 : vector<16x16x4xf32>
    %c2_52 = arith.constant 2 : index
    %c1_53 = arith.constant 1 : index
    %c0_54 = arith.constant 0 : index
    %66 = vector.load %arg8[%c2_52, %c1_53, %c0_54] : memref<18x18x4xf32, #tpu.memory_space<vmem>>, vector<16x16x4xf32>
    %c7 = arith.constant 7 : index
    %c0_55 = arith.constant 0 : index
    %67 = vector.load %arg3[%c7, %c0_55] : memref<9x4xf32, #tpu.memory_space<vmem>>, vector<1x4xf32>
    %68 = vector.shape_cast %67 : vector<1x4xf32> to vector<4xf32>
    %69 = vector.shape_cast %68 : vector<4xf32> to vector<1x1x4xf32>
    %70 = vector.broadcast %69 : vector<1x1x4xf32> to vector<16x16x4xf32>
    %71 = arith.mulf %66, %70 : vector<16x16x4xf32>
    %72 = arith.addf %65, %71 : vector<16x16x4xf32>
    %c2_56 = arith.constant 2 : index
    %c2_57 = arith.constant 2 : index
    %c0_58 = arith.constant 0 : index
    %73 = vector.load %arg8[%c2_56, %c2_57, %c0_58] : memref<18x18x4xf32, #tpu.memory_space<vmem>>, vector<16x16x4xf32>
    %c8 = arith.constant 8 : index
    %c0_59 = arith.constant 0 : index
    %74 = vector.load %arg3[%c8, %c0_59] : memref<9x4xf32, #tpu.memory_space<vmem>>, vector<1x4xf32>
    %75 = vector.shape_cast %74 : vector<1x4xf32> to vector<4xf32>
    %76 = vector.shape_cast %75 : vector<4xf32> to vector<1x1x4xf32>
    %77 = vector.broadcast %76 : vector<1x1x4xf32> to vector<16x16x4xf32>
    %78 = arith.mulf %73, %77 : vector<16x16x4xf32>
    %79 = arith.addf %72, %78 : vector<16x16x4xf32>
    %80 = vector.shape_cast %79 : vector<16x16x4xf32> to vector<256x4xf32>
    %c0_60 = arith.constant 0 : index
    %c0_61 = arith.constant 0 : index
    %81 = vector.load %arg5[%c0_60, %c0_61] : memref<4x4xf32, #tpu.memory_space<vmem>>, vector<4x4xf32>
    %cst_62 = arith.constant dense<0.000000e+00> : vector<256x4xf32>
    %82 = tpu.matmul %80, %81, %cst_62 {dimension_numbers = #tpu.dot_dimension_numbers<[1], [0], [0], [1], [0, 0, 1, 1], [], []>} : vector<256x4xf32>, vector<4x4xf32>, vector<256x4xf32> -> vector<256x4xf32>
    %c0_63 = arith.constant 0 : index
    %c0_64 = arith.constant 0 : index
    %83 = vector.load %arg6[%c0_63, %c0_64] : memref<1x4xf32, #tpu.memory_space<vmem>>, vector<1x4xf32>
    %84 = vector.shape_cast %83 : vector<1x4xf32> to vector<4xf32>
    %85 = vector.shape_cast %84 : vector<4xf32> to vector<1x4xf32>
    %86 = vector.broadcast %85 : vector<1x4xf32> to vector<256x4xf32>
    %87 = arith.addf %82, %86 : vector<256x4xf32>
    %88 = vector.shape_cast %87 : vector<256x4xf32> to vector<16x16x4xf32>
    %c0_65 = arith.constant 0 : index
    %c0_66 = arith.constant 0 : index
    %c0_67 = arith.constant 0 : index
    %c0_68 = arith.constant 0 : index
    %89 = vector.load %arg7[%c0_65, %c0_66, %c0_67, %c0_68] : memref<1x16x16x4xf32, #tpu.memory_space<vmem>>, vector<1x16x16x4xf32>
    %90 = vector.shape_cast %89 : vector<1x16x16x4xf32> to vector<16x16x4xf32>
    %91 = vector.shape_cast %88 : vector<16x16x4xf32> to vector<1x16x16x4xf32>
    tpu.vector_store %arg7[%c0_65, %c0_66, %c0_67, %c0_68], %91 {strides = array<i32>} : memref<1x16x16x4xf32, #tpu.memory_space<vmem>>, vector<1x16x16x4xf32>,
    return
  }
  func.func @transform_0(%arg0: i32) -> (i32, i32, i32, i32) {
    %c0_i32 = arith.constant 0 : i32
    %c0_i32_0 = arith.constant 0 : i32
    %c0_i32_1 = arith.constant 0 : i32
    %c0_i32_2 = arith.constant 0 : i32
    return %arg0, %c0_i32, %c0_i32_0, %c0_i32_1 : i32, i32, i32, i32
  }
  func.func @transform_1(%arg0: i32) -> (i32, i32) {
    %c0_i32 = arith.constant 0 : i32
    %c0_i32_0 = arith.constant 0 : i32
    %c0_i32_1 = arith.constant 0 : i32
    return %c0_i32, %c0_i32_0 : i32, i32
  }
  func.func @transform_2(%arg0: i32) -> (i32, i32) {
    %c0_i32 = arith.constant 0 : i32
    %c0_i32_0 = arith.constant 0 : i32
    %c0_i32_1 = arith.constant 0 : i32
    return %c0_i32, %c0_i32_0 : i32, i32
  }
  func.func @transform_3(%arg0: i32) -> (i32, i32) {
    %c0_i32 = arith.constant 0 : i32
    %c0_i32_0 = arith.constant 0 : i32
    %c0_i32_1 = arith.constant 0 : i32
    return %c0_i32, %c0_i32_0 : i32, i32
  }
  func.func @transform_4(%arg0: i32) -> (i32, i32) {
    %c0_i32 = arith.constant 0 : i32
    %c0_i32_0 = arith.constant 0 : i32
    %c0_i32_1 = arith.constant 0 : i32
    return %c0_i32, %c0_i32_0 : i32, i32
  }
  func.func @transform_5(%arg0: i32) -> (i32, i32) {
    %c0_i32 = arith.constant 0 : i32
    %c0_i32_0 = arith.constant 0 : i32
    %c0_i32_1 = arith.constant 0 : i32
    return %c0_i32, %c0_i32_0 : i32, i32
  }
  func.func @transform_6(%arg0: i32) -> (i32, i32, i32, i32) {
    %c0_i32 = arith.constant 0 : i32
    %c0_i32_0 = arith.constant 0 : i32
    %c0_i32_1 = arith.constant 0 : i32
    %c0_i32_2 = arith.constant 0 : i32
    return %arg0, %c0_i32, %c0_i32_0, %c0_i32_1 : i32, i32, i32, i32
  }
}

</mosaic_0001>

<bundles_post_ra>
// kernel: tpu_custom_call.1
= control target key start
LH: loop header
LB: loop body
LE: loop exit
PB: predicated region body
PF: predicated region fallthrough
CT: control target
= control target key end

     0   :  { %s1919_s21 = smov 0   ;;  %s2736_s0 = inlined_call_operand.vmem [shape: f32[2,16,16,4], index: 0, kind: input, shape index: {}]   ;;  %s2737_s1 = inlined_call_operand.vmem [shape: f32[4,4], index: 1, kind: input, shape index: {}]   ;;  %s2738_s2 = inlined_call_operand.vmem [shape: f32[9,4], index: 2, kind: input, shape index: {}]   ;;  %s2739_s3 = inlined_call_operand.vmem [shape: f32[1,4], index: 3, kind: input, shape index: {}]   ;;  %s2740_s4 = inlined_call_operand.vmem [shape: f32[4,4], index: 4, kind: input, shape index: {}]   ;;  %s2741_s5 = inlined_call_operand.vmem [shape: f32[1,4], index: 5, kind: input, shape index: {}]   ;;  %s2742_s6 = inlined_call_operand.vmem [shape: f32[2,16,16,4], index: 6, kind: output, shape index: {}]  }
   0x1 LB: > { %s1764_s22 = sadd.s32 4294967295, %s1881_s21   ;;  %p1768_p0 = scmp.ge.s32.totalorder %s1881_s21, 1  ;;  %s1881_s21 = sphi %s1919_s21, %s16_s21  }
   0x2   : > { %p212_p1 = scmp.lt.s32.totalorder %s1881_s21, 3 }
   0x4   : > { %p213_p2 = pnand %p1768_p0, %p212_p1 }
   0x5   : > { %p242_p3 = scmp.lt.s32.totalorder (!%p213_p2), %s1764_s22, 1 }
   0x6   : > { %216 = sbr.rel (%p213_p2) target bundleno = 540 (0x21c), region = 44 }
   0xb   : > { %v327_v0 = vld [vmem:[%s2737_s1] sm:$0xf]  ;;  %vm424_vm0 = vcmask 1043456   ;;  %s2744_s22 = smov (!%p242_p3, %s1764_s22), 1  ;;  %vm252_vm1 = vcmask 31744   ;;  %v1883_v20 = vmov 0.0  }
   0xc   : > { %1773 = vmatpush.msk.msra.mxu0 %vm424_vm0, %v327_v0  ;;  %1843 = vmatpush.msk.msra.mxu2 %vm424_vm0, %v327_v0  ;;  %s1841_s25 = sshll.u32 %s2744_s22, 8  ;;  %253 = vst.msk [vmem:[#allocation2] sm:$0xff] %vm252_vm1, %v1883_v20  ;;  %vm262_vm2 = vcmask 24576   ;;  %vm255_vm3 = vcmask 25600   ;;  %v1460_v30 = vld [vmem:[%s2740_s4] sm:$0xf] }
   0xd   : > { %s1940_s28 = scalar_lea.vmem %s2736_s0, %s1841_s25  ;;  %254 = vst.msk [vmem:[#allocation2 + $0x8] sm:$0xff] %vm252_vm1, %v1883_v20  ;;  %v2076_v32 = vld [vmem:[%s2738_s2] ss:$0 sm:$0xff]  ;;  %1806 = vmatpush.msk.msra.mxu1 %vm424_vm0, %v1460_v30  ;;  %1844 = vmatpush.msk.msra.mxu3 %vm424_vm0, %v1460_v30  ;;  %v2092_v36 = vld [vmem:[%s2738_s2 + $0x1] ss:$0 sm:$0xff]  ;;  %s2490_s20 = scalar_lea.vmem %s2742_s6, %s1841_s25 }
   0xe   : > { %v295_v1 = vld [vmem:[%s1940_s28] sm:$0xff]  ;;  %v296_v2 = vld [vmem:[%s1940_s28 + $0x8] sm:$0xff]  ;;  %v297_v3 = vld [vmem:[%s1940_s28 + $0x10] sm:$0xff]  ;;  %258 = vst.msk [vmem:[#allocation2 + $0x198] sm:$0xff] %vm252_vm1, %v1883_v20 }
   0xf   : > { %1774 = vmatmul.msk.f32.vlgmr.msra.gmra.mxu0 %vm252_vm1, %v295_v1  ;;  %v298_v4 = vld [vmem:[%s1940_s28 + $0x18] sm:$0xff]  ;;  %v299_v5 = vld [vmem:[%s1940_s28 + $0x20] sm:$0xff]  ;;  %v300_v6 = vld [vmem:[%s1940_s28 + $0x28] sm:$0xff]  ;;  %259 = vst.msk [vmem:[#allocation2 + $0x1a0] sm:$0xff] %vm252_vm1, %v1883_v20 }
  0x10   : > { %v311_v7 = vld [vmem:[%s1940_s28 + $0x80] sm:$0xff]  ;;  %v301_v8 = vld [vmem:[%s1940_s28 + $0x30] sm:$0xff]  ;;  %v312_v9 = vld [vmem:[%s1940_s28 + $0x88] sm:$0xff]  ;;  %263 = vst.msk [vmem:[#allocation2 + $0x18] sm:$0x1] %vm262_vm2, %v1883_v20 }
  0x11   : > { %1790 = vmatmul.msk.f32.vlgmr.msra.gmra.mxu2 %vm252_vm1, %v311_v7  ;;  %v302_v10 = vld [vmem:[%s1940_s28 + $0x38] sm:$0xff]  ;;  %v313_v11 = vld [vmem:[%s1940_s28 + $0x90] sm:$0xff]  ;;  %v303_v12 = vld [vmem:[%s1940_s28 + $0x40] sm:$0xff]  ;;  %264 = vst.msk [vmem:[#allocation2 + $0x30] sm:$0x1] %vm262_vm2, %v1883_v20 }
  0x12   : > { %v314_v13 = vld [vmem:[%s1940_s28 + $0x98] sm:$0xff]  ;;  %v304_v14 = vld [vmem:[%s1940_s28 + $0x48] sm:$0xff]  ;;  %v315_v15 = vld [vmem:[%s1940_s28 + $0xa0] sm:$0xff]  ;;  %265 = vst.msk [vmem:[#allocation2 + $0x48] sm:$0x1] %vm262_vm2, %v1883_v20 }
  0x13   : > { %v305_v16 = vld [vmem:[%s1940_s28 + $0x50] sm:$0xff]  ;;  %v316_v17 = vld [vmem:[%s1940_s28 + $0xa8] sm:$0xff]  ;;  %v306_v18 = vld [vmem:[%s1940_s28 + $0x58] sm:$0xff]  ;;  %266 = vst.msk [vmem:[#allocation2 + $0x60] sm:$0x1] %vm262_vm2, %v1883_v20 }
  0x14   : > { %v317_v19 = vld [vmem:[%s1940_s28 + $0xb0] sm:$0xff]  ;;  %v307_v21 = vld [vmem:[%s1940_s28 + $0x60] sm:$0xff]  ;;  %v318_v22 = vld [vmem:[%s1940_s28 + $0xb8] sm:$0xff]  ;;  %267 = vst.msk [vmem:[#allocation2 + $0x78] sm:$0x1] %vm262_vm2, %v1883_v20 }
  0x15   : > { %268 = vst.msk [vmem:[#allocation2 + $0x90] sm:$0x1] %vm262_vm2, %v1883_v20  ;;  %v308_v23 = vld [vmem:[%s1940_s28 + $0x68] sm:$0xff]  ;;  %v319_v24 = vld [vmem:[%s1940_s28 + $0xc0] sm:$0xff]  ;;  %v309_v25 = vld [vmem:[%s1940_s28 + $0x70] sm:$0xff] }
  0x16   : > { %269 = vst.msk [vmem:[#allocation2 + $0xa8] sm:$0x1] %vm262_vm2, %v1883_v20  ;;  %v320_v26 = vld [vmem:[%s1940_s28 + $0xc8] sm:$0xff]  ;;  %v310_v27 = vld [vmem:[%s1940_s28 + $0x78] sm:$0xff]  ;;  %v321_v28 = vld [vmem:[%s1940_s28 + $0xd0] sm:$0xff] }
  0x17   : > { %1775 = vmatmul.msk.f32.gmra.mxu0 %vm252_vm1, %v296_v2  ;;  %270 = vst.msk [vmem:[#allocation2 + $0xc0] sm:$0x1] %vm262_vm2, %v1883_v20  ;;  %v322_v31 = vld [vmem:[%s1940_s28 + $0xd8] sm:$0xff]  ;;  %v573_v33 = vld [vmem:[#allocation2] sm:$0xff]  ;;  %v574_v37 = vld [vmem:[#allocation2 + $0x8] sm:$0xff] }
  0x18   : > { %271 = vst.msk [vmem:[#allocation2 + $0xd8] sm:$0x1] %vm262_vm2, %v1883_v20  ;;  %v607_v34 = vmul.f32 %v2076_v32, %v573_v33  ;;  %v2087_v35 = vld [vmem:[%s2739_s3] ss:$0 sm:$0xff]  ;;  %v675_v38 = vld [vmem:[#allocation2 + $0x1] sm:$0xff]  ;;  %v608_v40 = vmul.f32 %v2076_v32, %v574_v37 }
  0x19   : > { %1791 = vmatmul.msk.f32.gmra.mxu2 %vm252_vm1, %v312_v9  ;;  %272 = vst.msk [vmem:[#allocation2 + $0xf0] sm:$0x1] %vm262_vm2, %v1883_v20  ;;  %v709_v42 = vmul.f32 %v2092_v36, %v675_v38  ;;  %v2101_v43 = vld [vmem:[%s2738_s2 + $0x2] ss:$0 sm:$0xff]  ;;  %v2111_v51 = vld [vmem:[%s2738_s2 + $0x3] ss:$0 sm:$0xff] }
  0x1a   : > { %273 = vst.msk [vmem:[#allocation2 + $0x108] sm:$0x1] %vm262_vm2, %v1883_v20  ;;  %v643_v41 = vadd.f32 %v2087_v35, %v607_v34  ;;  %v323_v44 = vld [vmem:[%s1940_s28 + $0xe0] sm:$0xff]  ;;  %v644_v47 = vadd.f32 %v2087_v35, %v608_v40  ;;  %v324_v60 = vld [vmem:[%s1940_s28 + $0xe8] sm:$0xff] }
  0x1b   : > { %274 = vst.msk [vmem:[#allocation2 + $0x120] sm:$0x1] %vm262_vm2, %v1883_v20  ;;  %v773_v46 = vld [vmem:[#allocation2 + $0x2] sm:$0xff] }
  0x1c   : > { %275 = vst.msk [vmem:[#allocation2 + $0x138] sm:$0x1] %vm262_vm2, %v1883_v20  ;;  %v741_v49 = vadd.f32 %v709_v42, %v643_v41  ;;  %v807_v50 = vmul.f32 %v2101_v43, %v773_v46  ;;  %v2120_v61 = vld [vmem:[%s2738_s2 + $0x4] ss:$0 sm:$0xff]  ;;  %v2125_v62 = vld [vmem:[%s2738_s2 + $0x5] ss:$0 sm:$0xff] }
  0x1d   : > { %276 = vst.msk [vmem:[#allocation2 + $0x150] sm:$0x1] %vm262_vm2, %v1883_v20 }
  0x1e   : > { %277 = vst.msk [vmem:[#allocation2 + $0x168] sm:$0x1] %vm262_vm2, %v1883_v20  ;;  %v839_v57 = vadd.f32 %v807_v50, %v741_v49 }
  0x1f   : > { %1776 = vmatmul.msk.f32.gmra.mxu0 %vm252_vm1, %v297_v3  ;;  %278 = vst.msk [vmem:[#allocation2 + $0x180] sm:$0x1] %vm262_vm2, %v1883_v20 }
  0x20   : > { %279 = vst.msk [vmem:[#allocation2 + $0x29] sm:$0x1] %vm262_vm2, %v1883_v20 }
  0x21   : > { %1792 = vmatmul.msk.f32.gmra.mxu2 %vm252_vm1, %v313_v11  ;;  %280 = vst.msk [vmem:[#allocation2 + $0x41] sm:$0x1] %vm262_vm2, %v1883_v20 }
  0x22   : > { %281 = vst.msk [vmem:[#allocation2 + $0x59] sm:$0x1] %vm262_vm2, %v1883_v20 }
  0x23   : > { %282 = vst.msk [vmem:[#allocation2 + $0x71] sm:$0x1] %vm262_vm2, %v1883_v20 }
  0x24   : > { %283 = vst.msk [vmem:[#allocation2 + $0x89] sm:$0x1] %vm262_vm2, %v1883_v20 }
  0x25   : > { %284 = vst.msk [vmem:[#allocation2 + $0xa1] sm:$0x1] %vm262_vm2, %v1883_v20 }
  0x26   : > { %285 = vst.msk [vmem:[#allocation2 + $0xb9] sm:$0x1] %vm262_vm2, %v1883_v20 }
  0x27   : > { %1777 = vmatmul.msk.f32.gmra.mxu0 %vm252_vm1, %v298_v4  ;;  %286 = vst.msk [vmem:[#allocation2 + $0xd1] sm:$0x1] %vm262_vm2, %v1883_v20  ;;  %v2132_v4 = vld [vmem:[%s2738_s2 + $0x6] ss:$0 sm:$0xff] }
  0x28   : > { %287 = vst.msk [vmem:[#allocation2 + $0xe9] sm:$0x1] %vm262_vm2, %v1883_v20 }
  0x29   : > { %1793 = vmatmul.msk.f32.gmra.mxu2 %vm252_vm1, %v314_v13  ;;  %288 = vst.msk [vmem:[#allocation2 + $0x101] sm:$0x1] %vm262_vm2, %v1883_v20 }
  0x2a   : > { %289 = vst.msk [vmem:[#allocation2 + $0x119] sm:$0x1] %vm262_vm2, %v1883_v20 }
  0x2b   : > { %290 = vst.msk [vmem:[#allocation2 + $0x131] sm:$0x1] %vm262_vm2, %v1883_v20 }
  0x2c   : > { %291 = vst.msk [vmem:[#allocation2 + $0x149] sm:$0x1] %vm262_vm2, %v1883_v20 }
  0x2d   : > { %292 = vst.msk [vmem:[#allocation2 + $0x161] sm:$0x1] %vm262_vm2, %v1883_v20 }
  0x2e   : > { %293 = vst.msk [vmem:[#allocation2 + $0x179] sm:$0x1] %vm262_vm2, %v1883_v20 }
  0x2f   : > { %1778 = vmatmul.msk.f32.gmra.mxu0 %vm252_vm1, %v299_v5  ;;  %294 = vst.msk [vmem:[#allocation2 + $0x191] sm:$0x1] %vm262_vm2, %v1883_v20 }
  0x30   : > { %256 = vst.msk [vmem:[#allocation2 + $0x10] sm:$0x3] %vm255_vm3, %v1883_v20 }
  0x31   : > { %1794 = vmatmul.msk.f32.gmra.mxu2 %vm252_vm1, %v315_v15  ;;  %260 = vst.msk [vmem:[#allocation2 + $0x1a8] sm:$0x3] %vm255_vm3, %v1883_v20 }
  0x37   : > { %1779 = vmatmul.msk.f32.gmra.mxu0 %vm252_vm1, %v300_v6  ;;  %v676_v45 = vld [vmem:[#allocation2 + $0x9] sm:$0xff] }
  0x38   : > { %v710_v48 = vmul.f32 %v2092_v36, %v676_v45  ;;  %v774_v52 = vld [vmem:[#allocation2 + $0xa] sm:$0xff] }
  0x39   : > { %1795 = vmatmul.msk.f32.gmra.mxu2 %vm252_vm1, %v316_v17  ;;  %v808_v56 = vmul.f32 %v2101_v43, %v774_v52 }
  0x3a   : > { %v742_v55 = vadd.f32 %v710_v48, %v644_v47 }
  0x3c   : > { %v840_v1 = vadd.f32 %v808_v56, %v742_v55 }
  0x3f   : > { %1780 = vmatmul.msk.f32.gmra.mxu0 %vm252_vm1, %v301_v8 }
  0x41   : > { %1796 = vmatmul.msk.f32.gmra.mxu2 %vm252_vm1, %v317_v19 }
  0x47   : > { %1781 = vmatmul.msk.f32.gmra.mxu0 %vm252_vm1, %v302_v10 }
  0x49   : > { %1797 = vmatmul.msk.f32.gmra.mxu2 %vm252_vm1, %v318_v22 }
  0x4f   : > { %1782 = vmatmul.msk.f32.gmra.mxu0 %vm252_vm1, %v303_v12 }
  0x51   : > { %1798 = vmatmul.msk.f32.gmra.mxu2 %vm252_vm1, %v319_v24  ;;  %v2152_v24 = vld [vmem:[%s2738_s2 + $0x8] ss:$0 sm:$0xff] }
  0x57   : > { %1783 = vmatmul.msk.f32.gmra.mxu0 %vm252_vm1, %v304_v14  ;;  %v325_v14 = vld [vmem:[%s1940_s28 + $0xf0] sm:$0xff] }
  0x59   : > { %1799 = vmatmul.msk.f32.gmra.mxu2 %vm252_vm1, %v320_v26 }
  0x5f   : > { %1784 = vmatmul.msk.f32.gmra.mxu0 %vm252_vm1, %v305_v16 }
  0x61   : > { %1800 = vmatmul.msk.f32.gmra.mxu2 %vm252_vm1, %v321_v28 }
  0x67   : > { %1785 = vmatmul.msk.f32.gmra.mxu0 %vm252_vm1, %v306_v18  ;;  %v2145_v18 = vld [vmem:[%s2738_s2 + $0x7] ss:$0 sm:$0xff] }
  0x69   : > { %1801 = vmatmul.msk.f32.gmra.mxu2 %vm252_vm1, %v322_v31 }
  0x6f   : > { %1786 = vmatmul.msk.f32.gmra.mxu0 %vm252_vm1, %v307_v21 }
  0x71   : > { %1802 = vmatmul.msk.f32.gmra.mxu2 %vm252_vm1, %v323_v44  ;;  %v326_v44 = vld [vmem:[%s1940_s28 + $0xf8] sm:$0xff] }
  0x77   : > { %1787 = vmatmul.msk.f32.gmra.mxu0 %vm252_vm1, %v308_v23 }
  0x79   : > { %1803 = vmatmul.msk.f32.gmra.mxu2 %vm252_vm1, %v324_v60 }
  0x7f   : > { %1788 = vmatmul.msk.f32.gmra.mxu0 %vm252_vm1, %v309_v25 }
  0x81   : > { %1804 = vmatmul.msk.f32.gmra.mxu2 %vm252_vm1, %v325_v14 }
  0x87   : > { %1789 = vmatmul.msk.f32.gmra.mxu0 %vm252_vm1, %v310_v27 }
  0x89   : > { %1805 = vmatmul.msk.f32.gmra.mxu2 %vm252_vm1, %v326_v44 }
  0x8c   : > { %v445_v29 = vpop.f32.mrf.mxu0 }
  0x8d   : > { %541 = vst.msk [vmem:[#allocation2 + $0x19] sm:$0xff] %vm252_vm1, %v445_v29 }
  0x94   : > { %v448_v39 = vpop.f32.mrf.mxu0  ;;  %v871_v53 = vld [vmem:[#allocation2 + $0x18] sm:$0xff] }
  0x95   : > { %542 = vst.msk [vmem:[#allocation2 + $0x21] sm:$0xff] %vm252_vm1, %v448_v39  ;;  %v905_v58 = vmul.f32 %v2111_v51, %v871_v53  ;;  %v969_v63 = vld [vmem:[#allocation2 + $0x19] sm:$0xff]  ;;  %v609_v11 = vmul.f32 %v2076_v32, %v871_v53 }
  0x96   : > { %v1003_v5 = vmul.f32 %v2120_v61, %v969_v63  ;;  %v711_v26 = vmul.f32 %v2092_v36, %v969_v63 }
  0x97   : > { %v937_v3 = vadd.f32 %v905_v58, %v839_v57  ;;  %v645_v22 = vadd.f32 %v2087_v35, %v609_v11 }
  0x99   : > { %v1035_v12 = vadd.f32 %v1003_v5, %v937_v3  ;;  %v743_v37 = vadd.f32 %v711_v26, %v645_v22 }
  0x9c   : > { %v451_v54 = vpop.f32.mrf.mxu0  ;;  %v872_v59 = vld [vmem:[#allocation2 + $0x20] sm:$0xff] }
  0x9d   : > { %543 = vst.msk [vmem:[#allocation2 + $0x31] sm:$0xff] %vm252_vm1, %v451_v54  ;;  %v1067_v0 = vld [vmem:[#allocation2 + $0x1a] sm:$0xff]  ;;  %v906_v2 = vmul.f32 %v2111_v51, %v872_v59  ;;  %v610_v16 = vmul.f32 %v2076_v32, %v872_v59  ;;  %v1068_v19 = vld [vmem:[#allocation2 + $0x22] sm:$0xff] }
  0x9e   : > { %v1101_v6 = vmul.f32 %v2125_v62, %v1067_v0  ;;  %v970_v7 = vld [vmem:[#allocation2 + $0x21] sm:$0xff]  ;;  %v1102_v25 = vmul.f32 %v2125_v62, %v1068_v19  ;;  %v809_v29 = vmul.f32 %v2101_v43, %v1067_v0  ;;  %v810_v50 = vmul.f32 %v2101_v43, %v1068_v19 }
  0x9f   : > { %v938_v10 = vadd.f32 %v906_v2, %v840_v1  ;;  %v1004_v15 = vmul.f32 %v2120_v61, %v970_v7  ;;  %v646_v27 = vadd.f32 %v2087_v35, %v610_v16  ;;  %v712_v38 = vmul.f32 %v2092_v36, %v970_v7 }
  0xa0   : > { %v1133_v17 = vadd.f32 %v1101_v6, %v1035_v12  ;;  %v841_v49 = vadd.f32 %v809_v29, %v743_v37 }
  0xa1   : > { %v1036_v21 = vadd.f32 %v1004_v15, %v938_v10  ;;  %v744_v46 = vadd.f32 %v712_v38, %v646_v27 }
  0xa3   : > { %v1134_v33 = vadd.f32 %v1102_v25, %v1036_v21  ;;  %v842_v56 = vadd.f32 %v810_v50, %v744_v46 }
  0xa4   : > { %v454_v8 = vpop.f32.mrf.mxu0  ;;  %v1166_v9 = vld [vmem:[#allocation2 + $0x30] sm:$0xff] }
  0xa5   : > { %544 = vst.msk [vmem:[#allocation2 + $0x39] sm:$0xff] %vm252_vm1, %v454_v8  ;;  %v1200_v13 = vmul.f32 %v2132_v4, %v1166_v9  ;;  %v1264_v20 = vld [vmem:[#allocation2 + $0x31] sm:$0xff]  ;;  %v907_v42 = vmul.f32 %v2111_v51, %v1166_v9  ;;  %v611_v1 = vmul.f32 %v2076_v32, %v1166_v9 }
  0xa6   : > { %v1298_v28 = vmul.f32 %v2145_v18, %v1264_v20  ;;  %v1005_v58 = vmul.f32 %v2120_v61, %v1264_v20  ;;  %v713_v15 = vmul.f32 %v2092_v36, %v1264_v20 }
  0xa7   : > { %v1232_v23 = vadd.f32 %v1200_v13, %v1133_v17  ;;  %v939_v54 = vadd.f32 %v907_v42, %v841_v49  ;;  %v647_v13 = vadd.f32 %v2087_v35, %v611_v1 }
  0xa9   : > { %v1330_v39 = vadd.f32 %v1298_v28, %v1232_v23  ;;  %v1037_v3 = vadd.f32 %v1005_v58, %v939_v54  ;;  %v745_v26 = vadd.f32 %v713_v15, %v647_v13 }
  0xac   : > { %v457_v30 = vpop.f32.mrf.mxu0  ;;  %v1362_v31 = vld [vmem:[#allocation2 + $0x32] sm:$0xff]  ;;  %v1363_v55 = vld [vmem:[#allocation2 + $0x3a] sm:$0xff] }
  0xad   : > { %v1167_v34 = vld [vmem:[#allocation2 + $0x38] sm:$0xff]  ;;  %545 = vst.msk [vmem:[#allocation2 + $0x49] sm:$0xff] %vm252_vm1, %v457_v30  ;;  %v1396_v40 = vmul.f32 %v2152_v24, %v1362_v31  ;;  %v1103_v59 = vmul.f32 %v2125_v62, %v1362_v31  ;;  %v1397_v2 = vmul.f32 %v2152_v24, %v1363_v55  ;;  %v1104_v14 = vmul.f32 %v2125_v62, %v1363_v55 }
  0xae   : > { %v1201_v41 = vmul.f32 %v2132_v4, %v1167_v34  ;;  %v1265_v45 = vld [vmem:[#allocation2 + $0x39] sm:$0xff]  ;;  %v908_v52 = vmul.f32 %v2111_v51, %v1167_v34  ;;  %v612_v7 = vmul.f32 %v2076_v32, %v1167_v34  ;;  %v811_v19 = vmul.f32 %v2101_v43, %v1362_v31 }
  0xaf   : > { %v1428_v47 = vadd.f32 %v1396_v40, %v1330_v39  ;;  %v1299_v53 = vmul.f32 %v2145_v18, %v1265_v45  ;;  %v1006_v6 = vmul.f32 %v2120_v61, %v1265_v45  ;;  %v1135_v10 = vadd.f32 %v1103_v59, %v1037_v3 }
  0xb0   : > { %v1233_v48 = vadd.f32 %v1201_v41, %v1134_v33  ;;  %v940_v0 = vadd.f32 %v908_v52, %v842_v56  ;;  %v648_v16 = vadd.f32 %v2087_v35, %v612_v7  ;;  %v714_v27 = vmul.f32 %v2092_v36, %v1265_v45  ;;  %v493_v33 = vpop.f32.mrf.mxu2 }
  0xb1   : > { %1807 = vmatmul.msk.f32.vlgmr.msra.gmra.mxu1 %vm252_vm1, %v1428_v47  ;;  %557 = vst.msk [vmem:[#allocation2 + $0xd9] sm:$0xff] %vm252_vm1, %v493_v33  ;;  %v843_v39 = vadd.f32 %v811_v19, %v745_v26  ;;  %v812_v40 = vmul.f32 %v2101_v43, %v1363_v55 }
  0xb2   : > { %v1331_v57 = vadd.f32 %v1299_v53, %v1233_v48  ;;  %v1038_v12 = vadd.f32 %v1006_v6, %v940_v0  ;;  %v746_v37 = vadd.f32 %v714_v27, %v648_v16 }
  0xb4   : > { %v460_v60 = vpop.f32.mrf.mxu0  ;;  %v1168_v63 = vld [vmem:[#allocation2 + $0x48] sm:$0xff]  ;;  %v1429_v8 = vadd.f32 %v1397_v2, %v1331_v57  ;;  %v1136_v23 = vadd.f32 %v1104_v14, %v1038_v12  ;;  %v844_v46 = vadd.f32 %v812_v40, %v746_v37 }
  0xb5   : > { %546 = vst.msk [vmem:[#allocation2 + $0x51] sm:$0xff] %vm252_vm1, %v460_v60  ;;  %v1202_v5 = vmul.f32 %v2132_v4, %v1168_v63  ;;  %v1266_v11 = vld [vmem:[#allocation2 + $0x49] sm:$0xff]  ;;  %v909_v30 = vmul.f32 %v2111_v51, %v1168_v63  ;;  %v613_v54 = vmul.f32 %v2076_v32, %v1168_v63 }
  0xb6   : > { %v1300_v17 = vmul.f32 %v2145_v18, %v1266_v11  ;;  %v1007_v48 = vmul.f32 %v2120_v61, %v1266_v11  ;;  %v715_v7 = vmul.f32 %v2092_v36, %v1266_v11 }
  0xb7   : > { %v1234_v9 = vadd.f32 %v1202_v5, %v1135_v10  ;;  %v941_v44 = vadd.f32 %v909_v30, %v843_v39  ;;  %v649_v63 = vadd.f32 %v2087_v35, %v613_v54 }
  0xb8   : > { %v496_v58 = vpop.f32.mrf.mxu2 }
  0xb9   : > { %1808 = vmatmul.msk.f32.gmra.mxu1 %vm252_vm1, %v1429_v8  ;;  %v1332_v28 = vadd.f32 %v1300_v17, %v1234_v9  ;;  %v1039_v56 = vadd.f32 %v1007_v48, %v941_v44  ;;  %558 = vst.msk [vmem:[#allocation2 + $0xe1] sm:$0xff] %vm252_vm1, %v496_v58  ;;  %v747_v16 = vadd.f32 %v715_v7, %v649_v63 }
  0xbc   : > { %v463_v21 = vpop.f32.mrf.mxu0  ;;  %v1364_v22 = vld [vmem:[#allocation2 + $0x4a] sm:$0xff]  ;;  %v1365_v45 = vld [vmem:[#allocation2 + $0x52] sm:$0xff] }
  0xbd   : > { %v1169_v25 = vld [vmem:[#allocation2 + $0x50] sm:$0xff]  ;;  %547 = vst.msk [vmem:[#allocation2 + $0x61] sm:$0xff] %vm252_vm1, %v463_v21  ;;  %v1398_v29 = vmul.f32 %v2152_v24, %v1364_v22  ;;  %v1105_v49 = vmul.f32 %v2125_v62, %v1364_v22  ;;  %v1399_v55 = vmul.f32 %v2152_v24, %v1365_v45  ;;  %v1106_v6 = vmul.f32 %v2125_v62, %v1365_v45 }
  0xbe   : > { %v1203_v20 = vmul.f32 %v2132_v4, %v1169_v25  ;;  %v1267_v34 = vld [vmem:[#allocation2 + $0x51] sm:$0xff]  ;;  %v910_v41 = vmul.f32 %v2111_v51, %v1169_v25  ;;  %v614_v60 = vmul.f32 %v2076_v32, %v1169_v25  ;;  %v813_v12 = vmul.f32 %v2101_v43, %v1364_v22 }
  0xbf   : > { %v1430_v31 = vadd.f32 %v1398_v29, %v1332_v28  ;;  %v1301_v42 = vmul.f32 %v2145_v18, %v1267_v34  ;;  %v1008_v59 = vmul.f32 %v2120_v61, %v1267_v34  ;;  %v1137_v1 = vadd.f32 %v1105_v49, %v1039_v56 }
  0xc0   : > { %v1235_v38 = vadd.f32 %v1203_v20, %v1136_v23  ;;  %v942_v53 = vadd.f32 %v910_v41, %v844_v46  ;;  %v650_v8 = vadd.f32 %v2087_v35, %v614_v60  ;;  %v716_v17 = vmul.f32 %v2092_v36, %v1267_v34  ;;  %v499_v25 = vpop.f32.mrf.mxu2 }
  0xc1   : > { %1809 = vmatmul.msk.f32.gmra.mxu1 %vm252_vm1, %v1430_v31  ;;  %559 = vst.msk [vmem:[#allocation2 + $0xf1] sm:$0xff] %vm252_vm1, %v499_v25  ;;  %v845_v29 = vadd.f32 %v813_v12, %v747_v16  ;;  %v814_v20 = vmul.f32 %v2101_v43, %v1365_v45 }
  0xc2   : > { %v1333_v47 = vadd.f32 %v1301_v42, %v1235_v38  ;;  %v1040_v3 = vadd.f32 %v1008_v59, %v942_v53  ;;  %v748_v27 = vadd.f32 %v716_v17, %v650_v8 }
  0xc4   : > { %v466_v50 = vpop.f32.mrf.mxu0  ;;  %v1170_v52 = vld [vmem:[#allocation2 + $0x60] sm:$0xff]  ;;  %v1431_v0 = vadd.f32 %v1399_v55, %v1333_v47  ;;  %v1138_v14 = vadd.f32 %v1106_v6, %v1040_v3  ;;  %v846_v31 = vadd.f32 %v814_v20, %v748_v27 }
  0xc5   : > { %548 = vst.msk [vmem:[#allocation2 + $0x69] sm:$0xff] %vm252_vm1, %v466_v50  ;;  %v1204_v57 = vmul.f32 %v2132_v4, %v1170_v52  ;;  %v1268_v2 = vld [vmem:[#allocation2 + $0x61] sm:$0xff]  ;;  %v911_v23 = vmul.f32 %v2111_v51, %v1170_v52  ;;  %v615_v46 = vmul.f32 %v2076_v32, %v1170_v52 }
  0xc6   : > { %v1302_v10 = vmul.f32 %v2145_v18, %v1268_v2  ;;  %v1009_v39 = vmul.f32 %v2120_v61, %v1268_v2  ;;  %v717_v60 = vmul.f32 %v2092_v36, %v1268_v2 }
  0xc7   : > { %v1236_v5 = vadd.f32 %v1204_v57, %v1137_v1  ;;  %v943_v34 = vadd.f32 %v911_v23, %v845_v29  ;;  %v651_v52 = vadd.f32 %v2087_v35, %v615_v46 }
  0xc8   : > { %v502_v49 = vpop.f32.mrf.mxu2 }
  0xc9   : > { %1810 = vmatmul.msk.f32.gmra.mxu1 %vm252_vm1, %v1431_v0  ;;  %v1334_v19 = vadd.f32 %v1302_v10, %v1236_v5  ;;  %v1041_v47 = vadd.f32 %v1009_v39, %v943_v34  ;;  %560 = vst.msk [vmem:[#allocation2 + $0xf9] sm:$0xff] %vm252_vm1, %v502_v49  ;;  %v749_v8 = vadd.f32 %v717_v60, %v651_v52 }
  0xcc   : > { %v469_v13 = vpop.f32.mrf.mxu0  ;;  %v1366_v9 = vld [vmem:[#allocation2 + $0x62] sm:$0xff]  ;;  %v1367_v37 = vld [vmem:[#allocation2 + $0x6a] sm:$0xff] }
  0xcd   : > { %v1171_v15 = vld [vmem:[#allocation2 + $0x68] sm:$0xff]  ;;  %549 = vst.msk [vmem:[#allocation2 + $0x79] sm:$0xff] %vm252_vm1, %v469_v13  ;;  %v1400_v21 = vmul.f32 %v2152_v24, %v1366_v9  ;;  %v1107_v40 = vmul.f32 %v2125_v62, %v1366_v9  ;;  %v1401_v45 = vmul.f32 %v2152_v24, %v1367_v37  ;;  %v1108_v59 = vmul.f32 %v2125_v62, %v1367_v37 }
  0xce   : > { %v1205_v11 = vmul.f32 %v2132_v4, %v1171_v15  ;;  %v1269_v26 = vld [vmem:[#allocation2 + $0x69] sm:$0xff]  ;;  %v912_v30 = vmul.f32 %v2111_v51, %v1171_v15  ;;  %v616_v53 = vmul.f32 %v2076_v32, %v1171_v15  ;;  %v815_v3 = vmul.f32 %v2101_v43, %v1366_v9 }
  0xcf   : > { %v1432_v22 = vadd.f32 %v1400_v21, %v1334_v19  ;;  %v1303_v33 = vmul.f32 %v2145_v18, %v1269_v26  ;;  %v1010_v50 = vmul.f32 %v2120_v61, %v1269_v26  ;;  %v1139_v55 = vadd.f32 %v1107_v40, %v1041_v47 }
  0xd0   : > { %v1237_v28 = vadd.f32 %v1205_v11, %v1138_v14  ;;  %v944_v44 = vadd.f32 %v912_v30, %v846_v31  ;;  %v652_v0 = vadd.f32 %v2087_v35, %v616_v53  ;;  %v718_v10 = vmul.f32 %v2092_v36, %v1269_v26  ;;  %v505_v15 = vpop.f32.mrf.mxu2 }
  0xd1   : > { %1811 = vmatmul.msk.f32.gmra.mxu1 %vm252_vm1, %v1432_v22  ;;  %561 = vst.msk [vmem:[#allocation2 + $0x109] sm:$0xff] %vm252_vm1, %v505_v15  ;;  %v847_v21 = vadd.f32 %v815_v3, %v749_v8  ;;  %v816_v11 = vmul.f32 %v2101_v43, %v1367_v37 }
  0xd2   : > { %v1335_v38 = vadd.f32 %v1303_v33, %v1237_v28  ;;  %v1042_v57 = vadd.f32 %v1010_v50, %v944_v44  ;;  %v750_v17 = vadd.f32 %v718_v10, %v652_v0 }
  0xd4   : > { %v472_v41 = vpop.f32.mrf.mxu0  ;;  %v1172_v42 = vld [vmem:[#allocation2 + $0x78] sm:$0xff]  ;;  %v1433_v54 = vadd.f32 %v1401_v45, %v1335_v38  ;;  %v1140_v6 = vadd.f32 %v1108_v59, %v1042_v57  ;;  %v848_v22 = vadd.f32 %v816_v11, %v750_v17 }
  0xd5   : > { %550 = vst.msk [vmem:[#allocation2 + $0x81] sm:$0xff] %vm252_vm1, %v472_v41  ;;  %v1206_v48 = vmul.f32 %v2132_v4, %v1172_v42  ;;  %v1270_v56 = vld [vmem:[#allocation2 + $0x79] sm:$0xff]  ;;  %v913_v14 = vmul.f32 %v2111_v51, %v1172_v42  ;;  %v617_v31 = vmul.f32 %v2076_v32, %v1172_v42 }
  0xd6   : > { %v1304_v1 = vmul.f32 %v2145_v18, %v1270_v56  ;;  %v1011_v29 = vmul.f32 %v2120_v61, %v1270_v56  ;;  %v719_v53 = vmul.f32 %v2092_v36, %v1270_v56 }
  0xd7   : > { %v1238_v58 = vadd.f32 %v1206_v48, %v1139_v55  ;;  %v945_v26 = vadd.f32 %v913_v14, %v847_v21  ;;  %v653_v42 = vadd.f32 %v2087_v35, %v617_v31 }
  0xd8   : > { %v508_v40 = vpop.f32.mrf.mxu2 }
  0xd9   : > { %1812 = vmatmul.msk.f32.gmra.mxu1 %vm252_vm1, %v1433_v54  ;;  %v1336_v12 = vadd.f32 %v1304_v1, %v1238_v58  ;;  %v1043_v38 = vadd.f32 %v1011_v29, %v945_v26  ;;  %562 = vst.msk [vmem:[#allocation2 + $0x111] sm:$0xff] %vm252_vm1, %v508_v40  ;;  %v751_v0 = vadd.f32 %v719_v53, %v653_v42 }
  0xdc   : > { %v475_v63 = vpop.f32.mrf.mxu0  ;;  %v1368_v5 = vld [vmem:[#allocation2 + $0x7a] sm:$0xff]  ;;  %v1369_v27 = vld [vmem:[#allocation2 + $0x82] sm:$0xff] }
  0xdd   : > { %v1173_v7 = vld [vmem:[#allocation2 + $0x80] sm:$0xff]  ;;  %551 = vst.msk [vmem:[#allocation2 + $0x91] sm:$0xff] %vm252_vm1, %v475_v63  ;;  %v1402_v13 = vmul.f32 %v2152_v24, %v1368_v5  ;;  %v1109_v20 = vmul.f32 %v2125_v62, %v1368_v5  ;;  %v1403_v37 = vmul.f32 %v2152_v24, %v1369_v27  ;;  %v1110_v50 = vmul.f32 %v2125_v62, %v1369_v27 }
  0xde   : > { %v1207_v2 = vmul.f32 %v2132_v4, %v1173_v7  ;;  %v1271_v16 = vld [vmem:[#allocation2 + $0x81] sm:$0xff]  ;;  %v914_v23 = vmul.f32 %v2111_v51, %v1173_v7  ;;  %v618_v45 = vmul.f32 %v2076_v32, %v1173_v7  ;;  %v817_v55 = vmul.f32 %v2101_v43, %v1368_v5 }
  0xdf   : > { %v1434_v9 = vadd.f32 %v1402_v13, %v1336_v12  ;;  %v1305_v25 = vmul.f32 %v2145_v18, %v1271_v16  ;;  %v1012_v41 = vmul.f32 %v2120_v61, %v1271_v16  ;;  %v1141_v46 = vadd.f32 %v1109_v20, %v1043_v38 }
  0xe0   : > { %v1239_v19 = vadd.f32 %v1207_v2, %v1140_v6  ;;  %v946_v34 = vadd.f32 %v914_v23, %v848_v22  ;;  %v654_v57 = vadd.f32 %v2087_v35, %v618_v45  ;;  %v720_v1 = vmul.f32 %v2092_v36, %v1271_v16  ;;  %v511_v7 = vpop.f32.mrf.mxu2 }
  0xe1   : > { %1813 = vmatmul.msk.f32.gmra.mxu1 %vm252_vm1, %v1434_v9  ;;  %563 = vst.msk [vmem:[#allocation2 + $0x121] sm:$0xff] %vm252_vm1, %v511_v7  ;;  %v849_v12 = vadd.f32 %v817_v55, %v751_v0  ;;  %v818_v15 = vmul.f32 %v2101_v43, %v1369_v27 }
  0xe2   : > { %v1337_v28 = vadd.f32 %v1305_v25, %v1239_v19  ;;  %v1044_v48 = vadd.f32 %v1012_v41, %v946_v34  ;;  %v752_v13 = vadd.f32 %v720_v1, %v654_v57  ;;  %v887_v57 = vld [vmem:[#allocation2 + $0xd8] sm:$0xff] }
  0xe3   : > { %v625_v7 = vmul.f32 %v2076_v32, %v887_v57 }
  0xe4   : > { %v478_v30 = vpop.f32.mrf.mxu0  ;;  %v1174_v33 = vld [vmem:[#allocation2 + $0x90] sm:$0xff]  ;;  %v1435_v44 = vadd.f32 %v1403_v37, %v1337_v28  ;;  %v1142_v59 = vadd.f32 %v1110_v50, %v1044_v48  ;;  %v850_v11 = vadd.f32 %v818_v15, %v752_v13 }
  0xe5   : > { %552 = vst.msk [vmem:[#allocation2 + $0x99] sm:$0xff] %vm252_vm1, %v478_v30  ;;  %v1208_v39 = vmul.f32 %v2132_v4, %v1174_v33  ;;  %v1272_v47 = vld [vmem:[#allocation2 + $0x91] sm:$0xff]  ;;  %v915_v6 = vmul.f32 %v2111_v51, %v1174_v33  ;;  %v619_v26 = vmul.f32 %v2076_v32, %v1174_v33 }
  0xe6   : > { %v1306_v54 = vmul.f32 %v2145_v18, %v1272_v47  ;;  %v1013_v19 = vmul.f32 %v2120_v61, %v1272_v47  ;;  %v721_v41 = vmul.f32 %v2092_v36, %v1272_v47 }
  0xe7   : > { %v1240_v49 = vadd.f32 %v1208_v39, %v1141_v46  ;;  %v947_v14 = vadd.f32 %v915_v6, %v849_v12  ;;  %v655_v33 = vadd.f32 %v2087_v35, %v619_v26  ;;  %v985_v12 = vld [vmem:[#allocation2 + $0xd9] sm:$0xff] }
  0xe8   : > { %v514_v20 = vpop.f32.mrf.mxu2 }
  0xe9   : > { %1814 = vmatmul.msk.f32.gmra.mxu1 %vm252_vm1, %v1435_v44  ;;  %v1338_v3 = vadd.f32 %v1306_v54, %v1240_v49  ;;  %v1045_v28 = vadd.f32 %v1013_v19, %v947_v14  ;;  %564 = vst.msk [vmem:[#allocation2 + $0x129] sm:$0xff] %vm252_vm1, %v514_v20  ;;  %v753_v53 = vadd.f32 %v721_v41, %v655_v33  ;;  %v2326_v41 = vld [vmem:[#allocation2 + $0xe0] sm:$0xff] }
  0xec   : > { %v481_v52 = vpop.f32.mrf.mxu0  ;;  %v1370_v58 = vld [vmem:[#allocation2 + $0x92] sm:$0xff]  ;;  %v1371_v17 = vld [vmem:[#allocation2 + $0x9a] sm:$0xff] }
  0xed   : > { %v1175_v60 = vld [vmem:[#allocation2 + $0x98] sm:$0xff]  ;;  %553 = vst.msk [vmem:[#allocation2 + $0xa9] sm:$0xff] %vm252_vm1, %v481_v52  ;;  %v1404_v63 = vmul.f32 %v2152_v24, %v1370_v58  ;;  %v1111_v21 = vmul.f32 %v2125_v62, %v1370_v58  ;;  %v1405_v22 = vmul.f32 %v2152_v24, %v1371_v17  ;;  %v819_v44 = vmul.f32 %v2101_v43, %v1370_v58 }
  0xee   : > { %v1209_v56 = vmul.f32 %v2132_v4, %v1175_v60  ;;  %v1273_v5 = vld [vmem:[#allocation2 + $0x99] sm:$0xff]  ;;  %v916_v16 = vmul.f32 %v2111_v51, %v1175_v60  ;;  %v620_v30 = vmul.f32 %v2076_v32, %v1175_v60  ;;  %v1112_v48 = vmul.f32 %v2125_v62, %v1371_v17 }
  0xef   : > { %v1436_v8 = vadd.f32 %v1404_v63, %v1338_v3  ;;  %v1307_v2 = vmul.f32 %v2145_v18, %v1273_v5  ;;  %v1143_v31 = vadd.f32 %v1111_v21, %v1045_v28  ;;  %v1014_v37 = vmul.f32 %v2120_v61, %v1273_v5  ;;  %v2311_v28 = vld [vmem:[#allocation2 + $0xda] sm:$0xff] }
  0xf0   : > { %v1241_v10 = vadd.f32 %v1209_v56, %v1142_v59  ;;  %v948_v29 = vadd.f32 %v916_v16, %v850_v11  ;;  %v656_v46 = vadd.f32 %v2087_v35, %v620_v30  ;;  %v722_v55 = vmul.f32 %v2092_v36, %v1273_v5  ;;  %v517_v60 = vpop.f32.mrf.mxu2 }
  0xf1   : > { %1815 = vmatmul.msk.f32.gmra.mxu1 %vm252_vm1, %v1436_v8  ;;  %v851_v1 = vadd.f32 %v819_v44, %v753_v53  ;;  %565 = vst.msk [vmem:[#allocation2 + $0x139] sm:$0xff] %vm252_vm1, %v517_v60  ;;  %v820_v8 = vmul.f32 %v2101_v43, %v1371_v17  ;;  %v661_v21 = vadd.f32 %v2087_v35, %v625_v7  ;;  %v2335_v53 = vld [vmem:[#allocation2 + $0xf0] sm:$0xff] }
  0xf2   : > { %v1339_v9 = vadd.f32 %v1307_v2, %v1241_v10  ;;  %v1046_v40 = vadd.f32 %v1014_v37, %v948_v29  ;;  %v754_v3 = vadd.f32 %v722_v55, %v656_v46  ;;  %v727_v17 = vmul.f32 %v2092_v36, %v985_v12 }
  0xf4   : > { %v484_v23 = vpop.f32.mrf.mxu0  ;;  %v1176_v25 = vld [vmem:[#allocation2 + $0xa8] sm:$0xff]  ;;  %v1437_v34 = vadd.f32 %v1405_v22, %v1339_v9  ;;  %v1144_v58 = vadd.f32 %v1112_v48, %v1046_v40  ;;  %v852_v16 = vadd.f32 %v820_v8, %v754_v3  ;;  %v2309_v22 = vmul.f32 %v2111_v51, %v887_v57 }
  0xf5   : > { %554 = vst.msk [vmem:[#allocation2 + $0xb1] sm:$0xff] %vm252_vm1, %v484_v23  ;;  %v1210_v27 = vmul.f32 %v2132_v4, %v1176_v25  ;;  %v1274_v38 = vld [vmem:[#allocation2 + $0xa9] sm:$0xff]  ;;  %v917_v54 = vmul.f32 %v2111_v51, %v1176_v25  ;;  %v621_v6 = vmul.f32 %v2076_v32, %v1176_v25  ;;  %v2333_v48 = vmul.f32 %v2132_v4, %v887_v57 }
  0xf6   : > { %v1308_v45 = vmul.f32 %v2145_v18, %v1274_v38  ;;  %v1015_v14 = vmul.f32 %v2120_v61, %v1274_v38  ;;  %v2348_v57 = vmul.f32 %v2111_v51, %v2326_v41 }
  0xf7   : > { %v1242_v39 = vadd.f32 %v1210_v27, %v1143_v31  ;;  %v949_v5 = vadd.f32 %v917_v54, %v851_v1  ;;  %v657_v19 = vadd.f32 %v2087_v35, %v621_v6  ;;  %v2337_v54 = vld [vmem:[#allocation2 + $0xf1] sm:$0xff]  ;;  %v923_v6 = vmul.f32 %v2111_v51, %v2335_v53 }
  0xf8   : > { %v520_v31 = vpop.f32.mrf.mxu2  ;;  %v2361_v7 = vmul.f32 %v2120_v61, %v2337_v54 }
  0xf9   : > { %1816 = vmatmul.msk.f32.gmra.mxu1 %vm252_vm1, %v1437_v34  ;;  %v1340_v47 = vadd.f32 %v1308_v45, %v1242_v39  ;;  %v1047_v23 = vadd.f32 %v1015_v14, %v949_v5  ;;  %v723_v34 = vmul.f32 %v2092_v36, %v1274_v38  ;;  %v2322_v39 = vmul.f32 %v2120_v61, %v985_v12 }
  0xfa   : > { %566 = vst.msk [vmem:[#allocation2 + $0x141] sm:$0xff] %vm252_vm1, %v520_v31  ;;  %v2330_v45 = vmul.f32 %v2125_v62, %v2311_v28 }
  0xfb   : > { %v755_v38 = vadd.f32 %v723_v34, %v657_v19  ;;  %v2374_v34 = vld [vmem:[#allocation2 + $0xe1] sm:$0xff] }
  0xfc   : > { %v487_v42 = vpop.f32.mrf.mxu0  ;;  %v1372_v49 = vld [vmem:[#allocation2 + $0xaa] sm:$0xff]  ;;  %v2301_v2 = vld [vmem:[#allocation2 + $0xb2] sm:$0xff] }
  0xfd   : > { %v1177_v50 = vld [vmem:[#allocation2 + $0xb0] sm:$0xff]  ;;  %555 = vst.msk [vmem:[#allocation2 + $0xc1] sm:$0xff] %vm252_vm1, %v487_v42  ;;  %v1406_v52 = vmul.f32 %v2152_v24, %v1372_v49  ;;  %v1113_v15 = vmul.f32 %v2125_v62, %v1372_v49  ;;  %v1407_v29 = vmul.f32 %v2152_v24, %v2301_v2  ;;  %v821_v40 = vmul.f32 %v2101_v43, %v1372_v49 }
  0xfe   : > { %v1211_v59 = vmul.f32 %v2132_v4, %v1177_v50  ;;  %v1275_v0 = vld [vmem:[#allocation2 + $0xb1] sm:$0xff]  ;;  %v918_v10 = vmul.f32 %v2111_v51, %v1177_v50  ;;  %v622_v27 = vmul.f32 %v2076_v32, %v1177_v50  ;;  %v1114_v60 = vmul.f32 %v2125_v62, %v2301_v2 }
  0xff   : > { %v1438_v63 = vadd.f32 %v1406_v52, %v1340_v47  ;;  %v1309_v13 = vmul.f32 %v2145_v18, %v1275_v0  ;;  %v1145_v37 = vadd.f32 %v1113_v15, %v1047_v23  ;;  %v1016_v33 = vmul.f32 %v2120_v61, %v1275_v0 }
 0x100   : > { %v1243_v56 = vadd.f32 %v1211_v59, %v1144_v58  ;;  %v950_v26 = vadd.f32 %v918_v10, %v852_v16  ;;  %v658_v55 = vadd.f32 %v2087_v35, %v622_v27  ;;  %v2344_v52 = vmul.f32 %v2145_v18, %v985_v12 }
 0x101   : > { %1817 = vmatmul.msk.f32.gmra.mxu1 %vm252_vm1, %v1438_v63  ;;  %v759_v58 = vadd.f32 %v727_v17, %v661_v21  ;;  %v853_v1 = vadd.f32 %v821_v40, %v755_v38  ;;  %v724_v3 = vmul.f32 %v2092_v36, %v1275_v0  ;;  %v523_v21 = vpop.f32.mrf.mxu2  ;;  %v822_v23 = vmul.f32 %v2101_v43, %v2301_v2  ;;  %v2382_v38 = vld [vmem:[#allocation2 + $0xe2] sm:$0xff] }
 0x102   : > { %v1341_v9 = vadd.f32 %v1309_v13, %v1243_v56  ;;  %v1048_v50 = vadd.f32 %v1016_v33, %v950_v26  ;;  %v825_v56 = vmul.f32 %v2101_v43, %v2311_v28  ;;  %567 = vst.msk [vmem:[#allocation2 + $0x151] sm:$0xff] %vm252_vm1, %v523_v21 }
 0x103   : > { %v756_v14 = vadd.f32 %v724_v3, %v658_v55 }
 0x104   : > { %v490_v11 = vpop.f32.mrf.mxu0  ;;  %v1178_v25 = vld [vmem:[#allocation2 + $0xc0] sm:$0xff]  ;;  %v1439_v44 = vadd.f32 %v1407_v29, %v1341_v9  ;;  %v1146_v10 = vadd.f32 %v1114_v60, %v1048_v50  ;;  %v857_v2 = vadd.f32 %v825_v56, %v759_v58  ;;  %v826_v56 = vmul.f32 %v2101_v43, %v2382_v38 }
 0x105   : > { %556 = vst.msk [vmem:[#allocation2 + $0xc9] sm:$0xff] %vm252_vm1, %v490_v11  ;;  %v1212_v20 = vmul.f32 %v2132_v4, %v1178_v25  ;;  %v623_v30 = vmul.f32 %v2076_v32, %v1178_v25  ;;  %v1276_v46 = vld [vmem:[#allocation2 + $0xc1] sm:$0xff]  ;;  %v919_v49 = vmul.f32 %v2111_v51, %v1178_v25  ;;  %v626_v25 = vmul.f32 %v2076_v32, %v2326_v41 }
 0x106   : > { %v1310_v59 = vmul.f32 %v2145_v18, %v1276_v46  ;;  %v725_v63 = vmul.f32 %v2092_v36, %v1276_v46  ;;  %v1017_v17 = vmul.f32 %v2120_v61, %v1276_v46 }
 0x107   : > { %v1244_v42 = vadd.f32 %v1212_v20, %v1145_v37  ;;  %v659_v47 = vadd.f32 %v2087_v35, %v623_v30  ;;  %v951_v13 = vadd.f32 %v919_v49, %v853_v1  ;;  %v662_v55 = vadd.f32 %v2087_v35, %v626_v25 }
 0x109   : > { %1818 = vmatmul.msk.f32.gmra.mxu1 %vm252_vm1, %v1439_v44  ;;  %v1342_v5 = vadd.f32 %v1310_v59, %v1244_v42  ;;  %v757_v9 = vadd.f32 %v725_v63, %v659_v47  ;;  %v1049_v46 = vadd.f32 %v1017_v17, %v951_v13  ;;  %v854_v42 = vadd.f32 %v822_v23, %v756_v14  ;;  %v1183_v13 = vld [vmem:[#allocation2 + $0xf8] sm:$0xff]  ;;  %v526_v14 = vpop.f32.mrf.mxu2 }
 0x10a   : > { %v728_v47 = vmul.f32 %v2092_v36, %v2374_v34  ;;  %v955_v63 = vadd.f32 %v923_v6, %v857_v2  ;;  %568 = vst.msk [vmem:[#allocation2 + $0x159] sm:$0xff] %vm252_vm1, %v526_v14  ;;  %v924_v25 = vmul.f32 %v2111_v51, %v1183_v13 }
 0x10c   : > { %v1374_v8 = vld [vmem:[#allocation2 + $0xc2] sm:$0xff]  ;;  %v1375_v29 = vld [vmem:[#allocation2 + $0xca] sm:$0xff] }
 0x10d   : > { %v1179_v12 = vld [vmem:[#allocation2 + $0xc8] sm:$0xff]  ;;  %v1408_v0 = vmul.f32 %v2152_v24, %v1374_v8  ;;  %v823_v19 = vmul.f32 %v2101_v43, %v1374_v8  ;;  %v1115_v30 = vmul.f32 %v2125_v62, %v1374_v8  ;;  %v824_v49 = vmul.f32 %v2101_v43, %v1375_v29 }
 0x10e   : > { %v1213_v15 = vmul.f32 %v2132_v4, %v1179_v12  ;;  %v1277_v16 = vld [vmem:[#allocation2 + $0xc9] sm:$0xff]  ;;  %v624_v11 = vmul.f32 %v2076_v32, %v1179_v12  ;;  %v920_v33 = vmul.f32 %v2111_v51, %v1179_v12  ;;  %v1378_v12 = vld [vmem:[#allocation2 + $0xf2] sm:$0xff] }
 0x10f   : > { %v1440_v26 = vadd.f32 %v1408_v0, %v1342_v5  ;;  %v855_v20 = vadd.f32 %v823_v19, %v757_v9  ;;  %v726_v37 = vmul.f32 %v2092_v36, %v1277_v16  ;;  %v1311_v40 = vmul.f32 %v2145_v18, %v1277_v16 }
 0x110   : > { %v1245_v27 = vadd.f32 %v1213_v15, %v1146_v10  ;;  %v660_v31 = vadd.f32 %v2087_v35, %v624_v11  ;;  %v1147_v60 = vadd.f32 %v1115_v30, %v1049_v46  ;;  %v952_v1 = vadd.f32 %v920_v33, %v854_v42  ;;  %v1184_v30 = vld [vmem:[#allocation2 + $0x108] sm:$0xff] }
 0x111   : > { %1819 = vmatmul.msk.f32.gmra.mxu1 %vm252_vm1, %v1440_v26  ;;  %v953_v44 = vadd.f32 %v2309_v22, %v855_v20  ;;  %v1020_v22 = vmul.f32 %v2120_v61, %v2374_v34  ;;  %v1409_v5 = vmul.f32 %v2152_v24, %v1375_v29  ;;  %v1216_v10 = vmul.f32 %v2132_v4, %v2335_v53 }
 0x112   : > { %v758_v50 = vadd.f32 %v726_v37, %v660_v31  ;;  %v1343_v59 = vadd.f32 %v1311_v40, %v1245_v27  ;;  %v1314_v0 = vmul.f32 %v2145_v18, %v2337_v54  ;;  %v760_v15 = vadd.f32 %v728_v47, %v662_v55  ;;  %v1281_v40 = vld [vmem:[#allocation2 + $0xf9] sm:$0xff] }
 0x113   : > { %v1051_v58 = vadd.f32 %v2322_v39, %v953_v44  ;;  %v1018_v39 = vmul.f32 %v2120_v61, %v1277_v16  ;;  %v627_v9 = vmul.f32 %v2076_v32, %v2335_v53  ;;  %v1246_v21 = vadd.f32 %v2333_v48, %v1147_v60 }
 0x114   : > { %v856_v3 = vadd.f32 %v824_v49, %v758_v50  ;;  %v1118_v16 = vmul.f32 %v2125_v62, %v2382_v38  ;;  %v1119_v23 = vmul.f32 %v2125_v62, %v1378_v12  ;;  %v1412_v26 = vmul.f32 %v2152_v24, %v1378_v12  ;;  %v529_v49 = vpop.f32.mrf.mxu2 }
 0x115   : > { %v1149_v8 = vadd.f32 %v2330_v45, %v1051_v58  ;;  %v1441_v45 = vadd.f32 %v1409_v5, %v1343_v59  ;;  %v1050_v17 = vadd.f32 %v1018_v39, %v952_v1  ;;  %v1217_v53 = vmul.f32 %v2132_v4, %v1183_v13  ;;  %569 = vst.msk [vmem:[#allocation2 + $0x169] sm:$0xff] %vm252_vm1, %v529_v49  ;;  %v1379_v1 = vld [vmem:[#allocation2 + $0xfa] sm:$0xff] }
 0x116   : > { %v954_v6 = vadd.f32 %v2348_v57, %v856_v3  ;;  %v1116_v27 = vmul.f32 %v2125_v62, %v1375_v29  ;;  %v1053_v48 = vadd.f32 %v2361_v7, %v955_v63  ;;  %v858_v31 = vadd.f32 %v826_v56, %v760_v15 }
 0x117   : > { %v1248_v19 = vadd.f32 %v1216_v10, %v1149_v8  ;;  %v729_v37 = vmul.f32 %v2092_v36, %v2337_v54  ;;  %v1344_v2 = vadd.f32 %v2344_v52, %v1246_v21  ;;  %v663_v46 = vadd.f32 %v2087_v35, %v627_v9 }
 0x118   : > { %v1052_v11 = vadd.f32 %v1020_v22, %v954_v6  ;;  %v1148_v44 = vadd.f32 %v1116_v27, %v1050_v17  ;;  %v1410_v42 = vmul.f32 %v2152_v24, %v2311_v28  ;;  %v1315_v7 = vmul.f32 %v2145_v18, %v1281_v40  ;;  %v1282_v22 = vld [vmem:[#allocation2 + $0x109] sm:$0xff]  ;;  %v2463_v27 = vld [vmem:[%s2739_s3] ss:$0 sm:$0xff] }
 0x119   : > { %1820 = vmatmul.msk.f32.gmra.mxu1 %vm252_vm1, %v1441_v45  ;;  %v1346_v57 = vadd.f32 %v1314_v0, %v1248_v19  ;;  %v1215_v29 = vmul.f32 %v2132_v4, %v2326_v41  ;;  %v1218_v54 = vmul.f32 %v2132_v4, %v1184_v30  ;;  %v628_v52 = vmul.f32 %v2076_v32, %v1183_v13  ;;  %v1380_v0 = vld [vmem:[#allocation2 + $0x10a] sm:$0xff] }
 0x11a   : > { %v1150_v20 = vadd.f32 %v1118_v16, %v1052_v11  ;;  %v1151_v55 = vadd.f32 %v1119_v23, %v1053_v48  ;;  %v956_v47 = vadd.f32 %v924_v25, %v858_v31  ;;  %v1022_v59 = vmul.f32 %v2120_v61, %v1281_v40  ;;  %v1185_v6 = vld [vmem:[#allocation2 + $0x110] sm:$0xff] }
 0x11b   : > { %v1444_v33 = vadd.f32 %v1412_v26, %v1346_v57  ;;  %v827_v28 = vmul.f32 %v2101_v43, %v1378_v12  ;;  %v1442_v58 = vadd.f32 %v1410_v42, %v1344_v2  ;;  %v1247_v3 = vadd.f32 %v1215_v29, %v1148_v44  ;;  %v1283_v23 = vld [vmem:[#allocation2 + $0x111] sm:$0xff] }
 0x11c   : > { %v1249_v50 = vadd.f32 %v1217_v53, %v1150_v20  ;;  %v761_v63 = vadd.f32 %v729_v37, %v663_v46  ;;  %v1413_v41 = vmul.f32 %v2152_v24, %v1379_v1  ;;  %v1313_v32 = vmul.f32 %v2145_v18, %v2374_v34  ;;  %v532_v34 = vpop.f32.mrf.mxu2  ;;  %v2469_v20 = vld [vmem:[%s2738_s2 + $0x1] ss:$0 sm:$0xff]  ;;  %v1381_v37 = vld [vmem:[#allocation2 + $0x112] sm:$0xff]  ;;  %v2482_v46 = vld [vmem:[%s2738_s2 + $0x4] ss:$0 sm:$0xff] }
 0x11d   : > { %1823 = vmatmul.msk.f32.vlgmr.msra.gmra.mxu3 %vm252_vm1, %v1444_v33  ;;  %v664_v56 = vadd.f32 %v2087_v35, %v628_v52  ;;  %v730_v5 = vmul.f32 %v2092_v36, %v1281_v40  ;;  %v1250_v8 = vadd.f32 %v1218_v54, %v1151_v55  ;;  %v1316_v10 = vmul.f32 %v2145_v18, %v1282_v22  ;;  %v1186_v40 = vld [vmem:[#allocation2 + $0x120] sm:$0xff] }
 0x11e   : > { %v1347_v60 = vadd.f32 %v1315_v7, %v1249_v50  ;;  %v1054_v12 = vadd.f32 %v1022_v59, %v956_v47  ;;  %v1120_v13 = vmul.f32 %v2125_v62, %v1379_v1  ;;  %v1345_v14 = vadd.f32 %v1313_v32, %v1247_v3  ;;  %570 = vst.msk [vmem:[#allocation2 + $0x171] sm:$0xff] %vm252_vm1, %v532_v34  ;;  %v2497_v54 = vld [vmem:[%s2738_s2 + $0x2] ss:$0 sm:$0xff] }
 0x11f   : > { %v859_v15 = vadd.f32 %v827_v28, %v761_v63  ;;  %v925_v9 = vmul.f32 %v2111_v51, %v1184_v30  ;;  %v1411_v35 = vmul.f32 %v2152_v24, %v2382_v38  ;;  %v762_v36 = vadd.f32 %v730_v5, %v664_v56  ;;  %v2448_v51 = vld [vmem:[%s2738_s2] ss:$0 sm:$0xff] }
 0x120   : > { %v1445_v39 = vadd.f32 %v1413_v41, %v1347_v60  ;;  %v828_v45 = vmul.f32 %v2101_v43, %v1379_v1  ;;  %v1348_v19 = vadd.f32 %v1316_v10, %v1250_v8  ;;  %v1414_v21 = vmul.f32 %v2152_v24, %v1380_v0  ;;  %v2513_v1 = vld [vmem:[%s2738_s2 + $0x5] ss:$0 sm:$0xff]  ;;  %v2522_v10 = vld [vmem:[%s2738_s2 + $0x7] ss:$0 sm:$0xff] }
 0x121   : > { %1821 = vmatmul.msk.f32.gmra.mxu1 %vm252_vm1, %v1442_v58  ;;  %v1219_v17 = vmul.f32 %v2132_v4, %v1185_v6  ;;  %v629_v11 = vmul.f32 %v2448_v51, %v1184_v30  ;;  %v1443_v16 = vadd.f32 %v1411_v35, %v1345_v14  ;;  %v1152_v38 = vadd.f32 %v1120_v13, %v1054_v12  ;;  %v2456_v4 = vld [vmem:[%s2738_s2 + $0x3] ss:$0 sm:$0xff] }
 0x122   : > { %v957_v25 = vadd.f32 %v925_v9, %v859_v15  ;;  %v1023_v43 = vmul.f32 %v2120_v61, %v1282_v22  ;;  %v860_v57 = vadd.f32 %v828_v45, %v762_v36  ;;  %v926_v26 = vmul.f32 %v2456_v4, %v1185_v6  ;;  %v1284_v58 = vld [vmem:[#allocation2 + $0x121] sm:$0xff]  ;;  %v1285_v15 = vld [vmem:[#allocation2 + $0x129] sm:$0xff] }
 0x123   : > { %v1317_v53 = vmul.f32 %v2145_v18, %v1283_v23  ;;  %v665_v61 = vadd.f32 %v2463_v27, %v629_v11  ;;  %v731_v48 = vmul.f32 %v2469_v20, %v1282_v22  ;;  %v1446_v30 = vadd.f32 %v1414_v21, %v1348_v19  ;;  %v2475_v18 = vld [vmem:[%s2741_s5] ss:$0 sm:$0xff]  ;;  %v1187_v22 = vld [vmem:[#allocation2 + $0x128] sm:$0xff] }
 0x124   : > { %v1251_v31 = vadd.f32 %v1219_v17, %v1152_v38  ;;  %v1055_v33 = vadd.f32 %v1023_v43, %v957_v25  ;;  %v1121_v2 = vmul.f32 %v2125_v62, %v1380_v0  ;;  %v958_v44 = vadd.f32 %v926_v26, %v860_v57  ;;  %v535_v50 = vpop.f32.mrf.mxu2  ;;  %v1382_v13 = vld [vmem:[#allocation2 + $0x122] sm:$0xff]  ;;  %v1383_v25 = vld [vmem:[#allocation2 + $0x12a] sm:$0xff]  ;;  %v1188_v57 = vld [vmem:[#allocation2 + $0x138] sm:$0xff] }
 0x125   : > { %1824 = vmatmul.msk.f32.gmra.mxu3 %vm252_vm1, %v1445_v39  ;;  %v1024_v42 = vmul.f32 %v2482_v46, %v1283_v23  ;;  %v1415_v7 = vmul.f32 %v2152_v24, %v1381_v37  ;;  %571 = vst.msk [vmem:[#allocation2 + $0x181] sm:$0xff] %vm252_vm1, %v535_v50  ;;  %v763_v29 = vadd.f32 %v731_v48, %v665_v61  ;;  %v2505_v24 = vld [vmem:[%s2738_s2 + $0x6] ss:$0 sm:$0xff]  ;;  %v2534_v21 = vld [vmem:[%s2738_s2 + $0x8] ss:$0 sm:$0xff] }
 0x126   : > { %v829_v49 = vmul.f32 %v2497_v54, %v1380_v0  ;;  %v630_v52 = vmul.f32 %v2448_v51, %v1185_v6  ;;  %v1349_v47 = vadd.f32 %v1317_v53, %v1251_v31  ;;  %v1153_v59 = vadd.f32 %v1121_v2, %v1055_v33 }
 0x127   : > { %v1220_v28 = vmul.f32 %v2505_v24, %v1186_v40  ;;  %v1056_v60 = vadd.f32 %v1024_v42, %v958_v44  ;;  %v1122_v3 = vmul.f32 %v2513_v1, %v1381_v37  ;;  %v927_v41 = vmul.f32 %v2456_v4, %v1186_v40  ;;  %v1286_v44 = vld [vmem:[#allocation2 + $0x139] sm:$0xff] }
 0x128   : > { %v861_v63 = vadd.f32 %v829_v49, %v763_v29  ;;  %v666_v32 = vadd.f32 %v2463_v27, %v630_v52  ;;  %v732_v56 = vmul.f32 %v2469_v20, %v1283_v23  ;;  %v1447_v5 = vadd.f32 %v1415_v7, %v1349_v47 }
 0x129   : > { %1822 = vmatmul.msk.f32.gmra.mxu1 %vm252_vm1, %v1443_v16  ;;  %v1252_v8 = vadd.f32 %v1220_v28, %v1153_v59  ;;  %v1318_v12 = vmul.f32 %v2522_v10, %v1284_v58  ;;  %v1154_v39 = vadd.f32 %v1122_v3, %v1056_v60  ;;  %v1221_v14 = vmul.f32 %v2505_v24, %v1187_v22  ;;  %v1384_v59 = vld [vmem:[#allocation2 + $0x13a] sm:$0xff] }
 0x12a   : > { %v959_v9 = vadd.f32 %v927_v41, %v861_v63  ;;  %v1025_v35 = vmul.f32 %v2482_v46, %v1284_v58  ;;  %v764_v34 = vadd.f32 %v732_v56, %v666_v32  ;;  %v830_v36 = vmul.f32 %v2497_v54, %v1381_v37  ;;  %v1189_v60 = vld [vmem:[#allocation2 + $0x140] sm:$0xff] }
 0x12b   : > { %v1350_v19 = vadd.f32 %v1318_v12, %v1252_v8  ;;  %v1416_v17 = vmul.f32 %v2534_v21, %v1382_v13  ;;  %v631_v11 = vmul.f32 %v2448_v51, %v1186_v40  ;;  %v1319_v16 = vmul.f32 %v2522_v10, %v1285_v15 }
 0x12c   : > { %v538_v0 = vpop.f32.mrf.mxu2  ;;  %v1123_v38 = vmul.f32 %v2513_v1, %v1382_v13  ;;  %v1253_v23 = vadd.f32 %v1221_v14, %v1154_v39  ;;  %v1057_v43 = vadd.f32 %v1025_v35, %v959_v9  ;;  %v862_v26 = vadd.f32 %v830_v36, %v764_v34 }
 0x12d   : > { %1825 = vmatmul.msk.f32.gmra.mxu3 %vm252_vm1, %v1446_v30  ;;  %572 = vst.msk [vmem:[#allocation2 + $0x189] sm:$0xff] %vm252_vm1, %v538_v0  ;;  %v928_v53 = vmul.f32 %v2456_v4, %v1187_v22  ;;  %v1448_v61 = vadd.f32 %v1416_v17, %v1350_v19  ;;  %v667_v48 = vadd.f32 %v2463_v27, %v631_v11  ;;  %v1190_v17 = vld [vmem:[#allocation2 + $0x150] sm:$0xff] }
 0x12e   : > { %v1581_v62 = vpop.f32.mrf.mxu1  ;;  %v733_v30 = vmul.f32 %v2469_v20, %v1284_v58  ;;  %v1417_v31 = vmul.f32 %v2534_v21, %v1383_v25  ;;  %v1222_v37 = vmul.f32 %v2505_v24, %v1188_v57  ;;  %v1351_v2 = vadd.f32 %v1319_v16, %v1253_v23 }
 0x12f   : > { %v1582_v55 = vadd.f32 %v2475_v18, %v1581_v62  ;;  %v1155_v40 = vadd.f32 %v1123_v38, %v1057_v43  ;;  %v960_v42 = vadd.f32 %v928_v53, %v862_v26  ;;  %v1026_v50 = vmul.f32 %v2482_v46, %v1285_v15 }
 0x130   : > { %v765_v7 = vadd.f32 %v733_v30, %v667_v48  ;;  %v831_v29 = vmul.f32 %v2497_v54, %v1382_v13  ;;  %v632_v49 = vmul.f32 %v2448_v51, %v1187_v22  ;;  %v1320_v52 = vmul.f32 %v2522_v10, %v1286_v44  ;;  %v1287_v13 = vld [vmem:[#allocation2 + $0x141] sm:$0xff] }
 0x131   : > { %1677 = vst.msk [vmem:[%s2490_s20] sm:$0xff] %vm252_vm1, %v1582_v55  ;;  %v1449_v55 = vadd.f32 %v1417_v31, %v1351_v2  ;;  %v1254_v47 = vadd.f32 %v1222_v37, %v1155_v40  ;;  %v1058_v28 = vadd.f32 %v1026_v50, %v960_v42  ;;  %v1124_v58 = vmul.f32 %v2513_v1, %v1383_v25  ;;  %v1386_v42 = vld [vmem:[#allocation2 + $0x152] sm:$0xff] }
 0x132   : > { %v863_v3 = vadd.f32 %v831_v29, %v765_v7  ;;  %v929_v63 = vmul.f32 %v2456_v4, %v1188_v57  ;;  %v668_v41 = vadd.f32 %v2463_v27, %v632_v49  ;;  %v734_v32 = vmul.f32 %v2469_v20, %v1285_v15 }
 0x133   : > { %v1418_v22 = vmul.f32 %v2534_v21, %v1384_v59  ;;  %v1223_v56 = vmul.f32 %v2505_v24, %v1189_v60  ;;  %v1352_v8 = vadd.f32 %v1320_v52, %v1254_v47  ;;  %v1156_v12 = vadd.f32 %v1124_v58, %v1058_v28  ;;  %v1191_v47 = vld [vmem:[#allocation2 + $0x158] sm:$0xff] }
 0x134   : > { %v1027_v39 = vmul.f32 %v2482_v46, %v1286_v44  ;;  %v832_v14 = vmul.f32 %v2497_v54, %v1383_v25  ;;  %v766_v9 = vadd.f32 %v734_v32, %v668_v41  ;;  %v633_v15 = vmul.f32 %v2448_v51, %v1188_v57 }
 0x135   : > { %1826 = vmatmul.msk.f32.gmra.mxu3 %vm252_vm1, %v1447_v5  ;;  %v1321_v35 = vmul.f32 %v2522_v10, %v1287_v13  ;;  %v1450_v34 = vadd.f32 %v1418_v22, %v1352_v8  ;;  %v1255_v36 = vadd.f32 %v1223_v56, %v1156_v12  ;;  %v1125_v19 = vmul.f32 %v2513_v1, %v1384_v59  ;;  %v1289_v8 = vld [vmem:[#allocation2 + $0x159] sm:$0xff] }
 0x136   : > { %v1584_v6 = vpop.f32.mrf.mxu1  ;;  %v930_v11 = vmul.f32 %v2456_v4, %v1189_v60  ;;  %v864_v38 = vadd.f32 %v832_v14, %v766_v9  ;;  %v669_v23 = vadd.f32 %v2463_v27, %v633_v15  ;;  %v735_v25 = vmul.f32 %v2469_v20, %v1286_v44 }
 0x137   : > { %v1585_v45 = vadd.f32 %v2475_v18, %v1584_v6  ;;  %v961_v6 = vadd.f32 %v929_v63, %v863_v3  ;;  %v1224_v57 = vmul.f32 %v2505_v24, %v1190_v17  ;;  %v1353_v53 = vadd.f32 %v1321_v35, %v1255_v36  ;;  %v1387_v35 = vld [vmem:[#allocation2 + $0x15a] sm:$0xff] }
 0x138   : > { %v1028_v48 = vmul.f32 %v2482_v46, %v1287_v13  ;;  %v833_v30 = vmul.f32 %v2497_v54, %v1384_v59  ;;  %v634_v31 = vmul.f32 %v2448_v51, %v1189_v60  ;;  %v962_v2 = vadd.f32 %v930_v11, %v864_v38 }
 0x139   : > { %1678 = vst.msk [vmem:[%s2490_s20 + $0x8] sm:$0xff] %vm252_vm1, %v1585_v45  ;;  %v1385_v45 = vld [vmem:[#allocation2 + $0x142] sm:$0xff]  ;;  %v1059_v16 = vadd.f32 %v1027_v39, %v961_v6  ;;  %v767_v40 = vadd.f32 %v735_v25, %v669_v23  ;;  %v736_v29 = vmul.f32 %v2469_v20, %v1287_v13  ;;  %v1420_v28 = vmul.f32 %v2534_v21, %v1386_v42 }
 0x13a   : > { %v1419_v43 = vmul.f32 %v2534_v21, %v1385_v45  ;;  %v1126_v50 = vmul.f32 %v2513_v1, %v1385_v45  ;;  %v670_v7 = vadd.f32 %v2463_v27, %v634_v31  ;;  %v635_v58 = vmul.f32 %v2448_v51, %v1190_v17 }
 0x13b   : > { %v865_v59 = vadd.f32 %v833_v30, %v767_v40  ;;  %v1225_v3 = vmul.f32 %v2505_v24, %v1191_v47  ;;  %v834_v32 = vmul.f32 %v2497_v54, %v1385_v45  ;;  %v1323_v14 = vmul.f32 %v2522_v10, %v1289_v8  ;;  %v1192_v45 = vld [vmem:[#allocation2 + $0x168] sm:$0xff] }
 0x13c   : > { %v1451_v49 = vadd.f32 %v1419_v43, %v1353_v53  ;;  %v768_v41 = vadd.f32 %v736_v29, %v670_v7  ;;  %v671_v13 = vadd.f32 %v2463_v27, %v635_v58  ;;  %v932_v6 = vmul.f32 %v2456_v4, %v1191_v47  ;;  %v1290_v53 = vld [vmem:[#allocation2 + $0x169] sm:$0xff] }
 0x13d   : > { %1827 = vmatmul.msk.f32.gmra.mxu3 %vm252_vm1, %v1448_v61  ;;  %v1288_v61 = vld [vmem:[#allocation2 + $0x151] sm:$0xff]  ;;  %v1127_v36 = vmul.f32 %v2513_v1, %v1386_v42  ;;  %v1226_v38 = vmul.f32 %v2505_v24, %v1192_v45  ;;  %v1030_v25 = vmul.f32 %v2482_v46, %v1289_v8  ;;  %v933_v30 = vmul.f32 %v2456_v4, %v1192_v45 }
 0x13e   : > { %v1587_v33 = vpop.f32.mrf.mxu1  ;;  %v1322_v44 = vmul.f32 %v2522_v10, %v1288_v61  ;;  %v1029_v63 = vmul.f32 %v2482_v46, %v1288_v61  ;;  %v737_v39 = vmul.f32 %v2469_v20, %v1288_v61  ;;  %v636_v61 = vmul.f32 %v2448_v51, %v1191_v47 }
 0x13f   : > { %v1588_v62 = vadd.f32 %v2475_v18, %v1587_v33  ;;  %v1157_v33 = vadd.f32 %v1125_v19, %v1059_v16  ;;  %v1421_v16 = vmul.f32 %v2534_v21, %v1387_v35  ;;  %v1324_v31 = vmul.f32 %v2522_v10, %v1290_v53 }
 0x140   : > { %v769_v19 = vadd.f32 %v737_v39, %v671_v13  ;;  %v1031_v29 = vmul.f32 %v2482_v46, %v1290_v53  ;;  %v1389_v39 = vld [vmem:[#allocation2 + $0x172] sm:$0xff] }
 0x141   : > { %1679 = vst.msk [vmem:[%s2490_s20 + $0x10] sm:$0xff] %vm252_vm1, %v1588_v62  ;;  %v931_v62 = vmul.f32 %v2456_v4, %v1190_v17  ;;  %v1256_v52 = vadd.f32 %v1224_v57, %v1157_v33  ;;  %v835_v17 = vmul.f32 %v2497_v54, %v1386_v42  ;;  %v1128_v33 = vmul.f32 %v2513_v1, %v1387_v35  ;;  %v1193_v42 = vld [vmem:[#allocation2 + $0x170] sm:$0xff] }
 0x142   : > { %v1227_v47 = vmul.f32 %v2505_v24, %v1193_v42 }
 0x143   : > { %v1354_v56 = vadd.f32 %v1322_v44, %v1256_v52  ;;  %v963_v12 = vadd.f32 %v931_v62, %v865_v59  ;;  %v1388_v44 = vld [vmem:[#allocation2 + $0x16a] sm:$0xff]  ;;  %v738_v62 = vmul.f32 %v2469_v20, %v1289_v8  ;;  %v637_v59 = vmul.f32 %v2448_v51, %v1192_v45 }
 0x144   : > { %v1422_v52 = vmul.f32 %v2534_v21, %v1388_v44 }
 0x145   : > { %1828 = vmatmul.msk.f32.gmra.mxu3 %vm252_vm1, %v1449_v55  ;;  %v1060_v55 = vadd.f32 %v1028_v48, %v962_v2  ;;  %v1452_v9 = vadd.f32 %v1420_v28, %v1354_v56  ;;  %v867_v48 = vadd.f32 %v835_v17, %v769_v19  ;;  %v673_v8 = vadd.f32 %v2463_v27, %v637_v59  ;;  %v1391_v59 = vld [vmem:[#allocation2 + $0x18a] sm:$0xff] }
 0x146   : > { %v1590_v5 = vpop.f32.mrf.mxu1  ;;  %v837_v19 = vmul.f32 %v2497_v54, %v1388_v44 }
 0x147   : > { %v1591_v0 = vadd.f32 %v2475_v18, %v1590_v5  ;;  %v1158_v5 = vadd.f32 %v1126_v50, %v1060_v55  ;;  %v672_v50 = vadd.f32 %v2463_v27, %v636_v61  ;;  %v965_v7 = vadd.f32 %v933_v30, %v867_v48  ;;  %v1195_v30 = vld [vmem:[#allocation2 + $0x188] sm:$0xff] }
 0x148   : > { %v1130_v48 = vmul.f32 %v2513_v1, %v1389_v39 }
 0x149   : > { %1680 = vst.msk [vmem:[%s2490_s20 + $0x18] sm:$0xff] %vm252_vm1, %v1591_v0  ;;  %v866_v0 = vadd.f32 %v834_v32, %v768_v41  ;;  %v1257_v15 = vadd.f32 %v1225_v3, %v1158_v5  ;;  %v770_v3 = vadd.f32 %v738_v62, %v672_v50  ;;  %v1063_v41 = vadd.f32 %v1031_v29, %v965_v7  ;;  %v1194_v5 = vld [vmem:[#allocation2 + $0x180] sm:$0xff] }
 0x14a   : > { %v1129_v32 = vmul.f32 %v2513_v1, %v1388_v44  ;;  %v838_v29 = vmul.f32 %v2497_v54, %v1389_v39 }
 0x14b   : > { %v964_v23 = vadd.f32 %v932_v6, %v866_v0  ;;  %v1355_v57 = vadd.f32 %v1323_v14, %v1257_v15  ;;  %v934_v0 = vmul.f32 %v2456_v4, %v1193_v42 }
 0x14c   : > { %v1161_v6 = vadd.f32 %v1129_v32, %v1063_v41 }
 0x14d   : > { %1829 = vmatmul.msk.f32.gmra.mxu3 %vm252_vm1, %v1450_v34  ;;  %v1061_v34 = vadd.f32 %v1029_v63, %v963_v12  ;;  %v1453_v2 = vadd.f32 %v1421_v16, %v1355_v57  ;;  %v836_v63 = vmul.f32 %v2497_v54, %v1387_v35  ;;  %v739_v12 = vmul.f32 %v2469_v20, %v1290_v53  ;;  %v1390_v53 = vld [vmem:[#allocation2 + $0x182] sm:$0xff] }
 0x14e   : > { %v1593_v26 = vpop.f32.mrf.mxu1  ;;  %v1425_v54 = vmul.f32 %v2534_v21, %v1391_v59 }
 0x14f   : > { %v1594_v37 = vadd.f32 %v2475_v18, %v1593_v26  ;;  %v1159_v26 = vadd.f32 %v1127_v36, %v1061_v34  ;;  %v868_v14 = vadd.f32 %v836_v63, %v770_v3  ;;  %v1423_v34 = vmul.f32 %v2534_v21, %v1389_v39  ;;  %v1292_v36 = vld [vmem:[#allocation2 + $0x181] sm:$0xff] }
 0x150   : > { %v771_v45 = vadd.f32 %v739_v12, %v673_v8 }
 0x151   : > { %1681 = vst.msk [vmem:[%s2490_s20 + $0x20] sm:$0xff] %vm252_vm1, %v1594_v37  ;;  %v1062_v37 = vadd.f32 %v1030_v25, %v964_v23  ;;  %v1258_v40 = vadd.f32 %v1226_v38, %v1159_v26  ;;  %v638_v38 = vmul.f32 %v2448_v51, %v1193_v42  ;;  %v1326_v25 = vmul.f32 %v2522_v10, %v1292_v36 }
 0x152   : > { %v869_v57 = vadd.f32 %v837_v19, %v771_v45  ;;  %v935_v26 = vmul.f32 %v2456_v4, %v1194_v5  ;;  %v1033_v42 = vmul.f32 %v2482_v46, %v1292_v36  ;;  %v1295_v45 = vld [vmem:[#allocation2 + $0x1a1] sm:$0xff] }
 0x153   : > { %v1160_v55 = vadd.f32 %v1128_v33, %v1062_v37  ;;  %v1356_v58 = vadd.f32 %v1324_v31, %v1258_v40  ;;  %v674_v31 = vadd.f32 %v2463_v27, %v638_v38  ;;  %v1229_v40 = vmul.f32 %v2505_v24, %v1195_v30  ;;  %v1293_v27 = vld [vmem:[#allocation2 + $0x189] sm:$0xff] }
 0x154   : > { %v967_v44 = vadd.f32 %v935_v26, %v869_v57  ;;  %v1034_v8 = vmul.f32 %v2482_v46, %v1293_v27 }
 0x155   : > { %1830 = vmatmul.msk.f32.gmra.mxu3 %vm252_vm1, %v1451_v49  ;;  %v1454_v13 = vadd.f32 %v1422_v52, %v1356_v58  ;;  %v1131_v52 = vmul.f32 %v2513_v1, %v1390_v53 }
 0x156   : > { %v1596_v60 = vpop.f32.mrf.mxu1 }
 0x157   : > { %v1597_v22 = vadd.f32 %v2475_v18, %v1596_v60  ;;  %v1291_v60 = vld [vmem:[#allocation2 + $0x171] sm:$0xff] }
 0x158   : > { %v1325_v56 = vmul.f32 %v2522_v10, %v1291_v60  ;;  %v1032_v16 = vmul.f32 %v2482_v46, %v1291_v60  ;;  %v740_v37 = vmul.f32 %v2469_v20, %v1291_v60  ;;  %v936_v60 = vmul.f32 %v2456_v4, %v1195_v30 }
 0x159   : > { %1682 = vst.msk [vmem:[%s2490_s20 + $0x28] sm:$0xff] %vm252_vm1, %v1597_v22  ;;  %v1259_v22 = vadd.f32 %v1227_v47, %v1160_v55  ;;  %v1327_v47 = vmul.f32 %v2522_v10, %v1293_v27 }
 0x15a   : > { %v772_v7 = vadd.f32 %v740_v37, %v674_v31 }
 0x15b   : > { %v1357_v35 = vadd.f32 %v1325_v56, %v1259_v22  ;;  %v1294_v56 = vld [vmem:[#allocation2 + $0x199] sm:$0xff] }
 0x15c   : > { %v870_v58 = vadd.f32 %v838_v29, %v772_v7  ;;  %v1328_v4 = vmul.f32 %v2522_v10, %v1294_v56 }
 0x15d   : > { %1831 = vmatmul.msk.f32.gmra.mxu3 %vm252_vm1, %v1452_v9  ;;  %v1228_v9 = vmul.f32 %v2505_v24, %v1194_v5 }
 0x15e   : > { %v1599_v11 = vpop.f32.mrf.mxu1  ;;  %v968_v5 = vadd.f32 %v936_v60, %v870_v58 }
 0x15f   : > { %v1600_v43 = vadd.f32 %v2475_v18, %v1599_v11  ;;  %v966_v11 = vadd.f32 %v934_v0, %v868_v14  ;;  %v1260_v23 = vadd.f32 %v1228_v9, %v1161_v6  ;;  %v1132_v14 = vmul.f32 %v2513_v1, %v1391_v59  ;;  %v1392_v0 = vld [vmem:[#allocation2 + $0x19a] sm:$0xff] }
 0x160   : > { %v1066_v39 = vadd.f32 %v1034_v8, %v968_v5  ;;  %v1197_v6 = vld [vmem:[#allocation2 + $0x1a0] sm:$0xff]  ;;  %v1426_v46 = vmul.f32 %v2534_v21, %v1392_v0 }
 0x161   : > { %1683 = vst.msk [vmem:[%s2490_s20 + $0x30] sm:$0xff] %vm252_vm1, %v1600_v43  ;;  %v1455_v43 = vadd.f32 %v1423_v34, %v1357_v35  ;;  %v1064_v61 = vadd.f32 %v1032_v16, %v966_v11  ;;  %v1358_v51 = vadd.f32 %v1326_v25, %v1260_v23  ;;  %v1231_v36 = vmul.f32 %v2505_v24, %v1197_v6  ;;  %v1393_v11 = vld [vmem:[#allocation2 + $0x1a2] sm:$0xff] }
 0x162   : > { %v1164_v34 = vadd.f32 %v1132_v14, %v1066_v39  ;;  %v1427_v25 = vmul.f32 %v2534_v21, %v1393_v11 }
 0x163   : > { %v1162_v62 = vadd.f32 %v1130_v48, %v1064_v61 }
 0x164   : > { %v1263_v1 = vadd.f32 %v1231_v36, %v1164_v34 }
 0x165   : > { %1832 = vmatmul.msk.f32.gmra.mxu3 %vm252_vm1, %v1453_v2  ;;  %v1424_v2 = vmul.f32 %v2534_v21, %v1390_v53  ;;  %v1261_v55 = vadd.f32 %v1229_v40, %v1162_v62 }
 0x166   : > { %v1602_v49 = vpop.f32.mrf.mxu1 }
 0x167   : > { %v1603_v28 = vadd.f32 %v2475_v18, %v1602_v49  ;;  %v1456_v20 = vadd.f32 %v1424_v2, %v1358_v51  ;;  %v1065_v49 = vadd.f32 %v1033_v42, %v967_v44  ;;  %v1359_v22 = vadd.f32 %v1327_v47, %v1261_v55 }
 0x169   : > { %1684 = vst.msk [vmem:[%s2490_s20 + $0x38] sm:$0xff] %vm252_vm1, %v1603_v28  ;;  %v1196_v28 = vld [vmem:[#allocation2 + $0x198] sm:$0xff]  ;;  %v1163_v63 = vadd.f32 %v1131_v52, %v1065_v49 }
 0x16a   : > { %v1230_v41 = vmul.f32 %v2505_v24, %v1196_v28 }
 0x16c   : > { %v1262_v12 = vadd.f32 %v1230_v41, %v1163_v63 }
 0x16d   : > { %1833 = vmatmul.msk.f32.gmra.mxu3 %vm252_vm1, %v1454_v13  ;;  %v1457_v13 = vadd.f32 %v1425_v54, %v1359_v22 }
 0x16e   : > { %v1605_v15 = vpop.f32.mrf.mxu1 }
 0x16f   : > { %v1606_v17 = vadd.f32 %v2475_v18, %v1605_v15  ;;  %v1360_v15 = vadd.f32 %v1328_v4, %v1262_v12 }
 0x171   : > { %1685 = vst.msk [vmem:[%s2490_s20 + $0x40] sm:$0xff] %vm252_vm1, %v1606_v17  ;;  %v1458_v19 = vadd.f32 %v1426_v46, %v1360_v15  ;;  %v1329_v17 = vmul.f32 %v2522_v10, %v1295_v45 }
 0x173   : > { %v1361_v23 = vadd.f32 %v1329_v17, %v1263_v1 }
 0x175   : > { %1834 = vmatmul.msk.f32.gmra.mxu3 %vm252_vm1, %v1455_v43  ;;  %v1459_v24 = vadd.f32 %v1427_v25, %v1361_v23 }
 0x176   : > { %v1608_v33 = vpop.f32.mrf.mxu1 }
 0x177   : > { %v1609_v50 = vadd.f32 %v2475_v18, %v1608_v33 }
 0x179   : > { %1686 = vst.msk [vmem:[%s2490_s20 + $0x48] sm:$0xff] %vm252_vm1, %v1609_v50 }
 0x17d   : > { %1835 = vmatmul.msk.f32.gmra.mxu3 %vm252_vm1, %v1456_v20 }
 0x17e   : > { %v1611_v3 = vpop.f32.mrf.mxu1 }
 0x17f   : > { %v1612_v32 = vadd.f32 %v2475_v18, %v1611_v3 }
 0x181   : > { %1687 = vst.msk [vmem:[%s2490_s20 + $0x50] sm:$0xff] %vm252_vm1, %v1612_v32 }
 0x185   : > { %1836 = vmatmul.msk.f32.gmra.mxu3 %vm252_vm1, %v1457_v13 }
 0x186   : > { %v1614_v9 = vpop.f32.mrf.mxu1 }
 0x187   : > { %v1615_v35 = vadd.f32 %v2475_v18, %v1614_v9 }
 0x189   : > { %1688 = vst.msk [vmem:[%s2490_s20 + $0x58] sm:$0xff] %vm252_vm1, %v1615_v35 }
 0x18d   : > { %1837 = vmatmul.msk.f32.gmra.mxu3 %vm252_vm1, %v1458_v19 }
 0x18e   : > { %v1617_v16 = vpop.f32.mrf.mxu1 }
 0x18f   : > { %v1618_v38 = vadd.f32 %v2475_v18, %v1617_v16 }
 0x191   : > { %1689 = vst.msk [vmem:[%s2490_s20 + $0x60] sm:$0xff] %vm252_vm1, %v1618_v38 }
 0x195   : > { %1838 = vmatmul.msk.f32.gmra.mxu3 %vm252_vm1, %v1459_v24 }
 0x196   : > { %v1620_v43 = vpop.f32.mrf.mxu1 }
 0x197   : > { %v1621_v10 = vadd.f32 %v2475_v18, %v1620_v43 }
 0x199   : > { %1690 = vst.msk [vmem:[%s2490_s20 + $0x68] sm:$0xff] %vm252_vm1, %v1621_v10 }
 0x19e   : > { %v1623_v57 = vpop.f32.mrf.mxu1 }
 0x19f   : > { %v1624_v26 = vadd.f32 %v2475_v18, %v1623_v57 }
 0x1a0   : > { %v1629_v53 = vpop.f32.mrf.mxu3 }
 0x1a1   : > { %1691 = vst.msk [vmem:[%s2490_s20 + $0x70] sm:$0xff] %vm252_vm1, %v1624_v26  ;;  %v1630_v21 = vadd.f32 %v2475_v18, %v1629_v53 }
 0x1a3   : > { %1693 = vst.msk [vmem:[%s2490_s20 + $0x80] sm:$0xff] %vm252_vm1, %v1630_v21 }
 0x1a6   : > { %v1626_v61 = vpop.f32.mrf.mxu1 }
 0x1a7   : > { %v1627_v48 = vadd.f32 %v2475_v18, %v1626_v61 }
 0x1a8   : > { %v1632_v30 = vpop.f32.mrf.mxu3 }
 0x1a9   : > { %1692 = vst.msk [vmem:[%s2490_s20 + $0x78] sm:$0xff] %vm252_vm1, %v1627_v48  ;;  %v1633_v31 = vadd.f32 %v2475_v18, %v1632_v30 }
 0x1ab   : > { %1694 = vst.msk [vmem:[%s2490_s20 + $0x88] sm:$0xff] %vm252_vm1, %v1633_v31 }
 0x1b0   : > { %v1635_v37 = vpop.f32.mrf.mxu3 }
 0x1b1   : > { %v1636_v51 = vadd.f32 %v2475_v18, %v1635_v37 }
 0x1b3   : > { %1695 = vst.msk [vmem:[%s2490_s20 + $0x90] sm:$0xff] %vm252_vm1, %v1636_v51 }
 0x1b8   : > { %v1638_v33 = vpop.f32.mrf.mxu3 }
 0x1b9   : > { %v1639_v2 = vadd.f32 %v2475_v18, %v1638_v33 }
 0x1bb   : > { %1696 = vst.msk [vmem:[%s2490_s20 + $0x98] sm:$0xff] %vm252_vm1, %v1639_v2 }
 0x1c0   : > { %v1641_v40 = vpop.f32.mrf.mxu3 }
 0x1c1   : > { %v1642_v44 = vadd.f32 %v2475_v18, %v1641_v40 }
 0x1c3   : > { %1697 = vst.msk [vmem:[%s2490_s20 + $0xa0] sm:$0xff] %vm252_vm1, %v1642_v44 }
 0x1c8   : > { %v1644_v42 = vpop.f32.mrf.mxu3 }
 0x1c9   : > { %v1645_v50 = vadd.f32 %v2475_v18, %v1644_v42 }
 0x1cb   : > { %1698 = vst.msk [vmem:[%s2490_s20 + $0xa8] sm:$0xff] %vm252_vm1, %v1645_v50 }
 0x1d0   : > { %v1647_v62 = vpop.f32.mrf.mxu3 }
 0x1d1   : > { %v1648_v7 = vadd.f32 %v2475_v18, %v1647_v62 }
 0x1d3   : > { %1699 = vst.msk [vmem:[%s2490_s20 + $0xb0] sm:$0xff] %vm252_vm1, %v1648_v7 }
 0x1d8   : > { %v1650_v29 = vpop.f32.mrf.mxu3 }
 0x1d9   : > { %v1651_v27 = vadd.f32 %v2475_v18, %v1650_v29 }
 0x1db   : > { %1700 = vst.msk [vmem:[%s2490_s20 + $0xb8] sm:$0xff] %vm252_vm1, %v1651_v27 }
 0x1e0   : > { %v1653_v20 = vpop.f32.mrf.mxu3 }
 0x1e1   : > { %v1654_v49 = vadd.f32 %v2475_v18, %v1653_v20 }
 0x1e3   : > { %1701 = vst.msk [vmem:[%s2490_s20 + $0xc0] sm:$0xff] %vm252_vm1, %v1654_v49 }
 0x1e8   : > { %v1656_v52 = vpop.f32.mrf.mxu3 }
 0x1e9   : > { %v1657_v55 = vadd.f32 %v2475_v18, %v1656_v52 }
 0x1eb   : > { %1702 = vst.msk [vmem:[%s2490_s20 + $0xc8] sm:$0xff] %vm252_vm1, %v1657_v55 }
 0x1f0   : > { %v1659_v47 = vpop.f32.mrf.mxu3 }
 0x1f1   : > { %v1660_v59 = vadd.f32 %v2475_v18, %v1659_v47 }
 0x1f3   : > { %1703 = vst.msk [vmem:[%s2490_s20 + $0xd0] sm:$0xff] %vm252_vm1, %v1660_v59 }
 0x1f8   : > { %v1662_v28 = vpop.f32.mrf.mxu3 }
 0x1f9   : > { %v1663_v58 = vadd.f32 %v2475_v18, %v1662_v28 }
 0x1fb   : > { %1704 = vst.msk [vmem:[%s2490_s20 + $0xd8] sm:$0xff] %vm252_vm1, %v1663_v58 }
 0x200   : > { %v1665_v60 = vpop.f32.mrf.mxu3 }
 0x201   : > { %v1666_v3 = vadd.f32 %v2475_v18, %v1665_v60 }
 0x203   : > { %1705 = vst.msk [vmem:[%s2490_s20 + $0xe0] sm:$0xff] %vm252_vm1, %v1666_v3 }
 0x208   : > { %v1668_v54 = vpop.f32.mrf.mxu3 }
 0x209   : > { %v1669_v63 = vadd.f32 %v2475_v18, %v1668_v54 }
 0x20b   : > { %1706 = vst.msk [vmem:[%s2490_s20 + $0xe8] sm:$0xff] %vm252_vm1, %v1669_v63 }
 0x210   : > { %v1671_v41 = vpop.f32.mrf.mxu3 }
 0x211   : > { %v1672_v32 = vadd.f32 %v2475_v18, %v1671_v41 }
 0x213   : > { %1707 = vst.msk [vmem:[%s2490_s20 + $0xf0] sm:$0xff] %vm252_vm1, %v1672_v32 }
 0x218   : > { %v1674_v22 = vpop.f32.mrf.mxu3 }
 0x219   : > { %v1675_v56 = vadd.f32 %v2475_v18, %v1674_v22 }
 0x21b   : > { %1708 = vst.msk [vmem:[%s2490_s20 + $0xf8] sm:$0xff] %vm252_vm1, %v1675_v56 }
 0x21c PF: > { %s16_s21 = sadd.s32 1, %s1881_s21  }
 0x21d   : > { %p13_p4 = scmp.ge.s32.totalorder %s16_s21, 4  }
 0x21f   :  { %15 = sbr.rel (!%p13_p4) target bundleno = 1 (0x1), region = 77 }

</bundles_post_ra>
